<compile_context>
chip_gen: v7x
topology: tpu7x:2x2x1
jax: 0.10.0
libtpu: 0.0.40
codegen_flags: <defaults>
</compile_context>

<pallas_src>
import math
from functools import partial

import jax
import jax.numpy as jnp
from jax.experimental import pallas as pl
from jax.experimental.pallas import tpu as pltpu


def _layernorm_f32(v, g, b, eps=1e-5):
    # LayerNorm statistics in float32 (matches the fp16-safe LayerNorm subclass).
    v = v.astype(jnp.float32)
    mu = jnp.mean(v, axis=-1, keepdims=True)
    c = v - mu
    var = jnp.mean(c * c, axis=-1, keepdims=True)
    return c * jax.lax.rsqrt(var + eps) * g + b


def residual_attention_block_kernel(
    x_ref,                        # (S, D)   input dtype (batch dim squeezed)
    ln1_g_ref, ln1_b_ref,         # (1, D)   f32
    w_qkv_ref, b_qkv_ref,         # (D, 3D) bf16, (1, 3D) f32   (in_proj, pre-transposed)
    w_o_ref, b_o_ref,             # (D, D)  bf16, (1, D)  f32   (out_proj, pre-transposed)
    ln2_g_ref, ln2_b_ref,         # (1, D)   f32
    w_fc_ref, b_fc_ref,           # (D, 4D) bf16, (1, 4D) f32
    w_proj_ref, b_proj_ref,       # (4D, D) bf16, (1, D)  f32
    out_ref,                      # (S, D)
    *, d_model, n_head,
):
    S = x_ref.shape[0]
    head_dim = d_model // n_head
    scale = 1.0 / math.sqrt(head_dim)
    mxu = jnp.bfloat16                       # MXU operand dtype (f32 accumulate)

    x = x_ref[...]                           # residual kept in the input dtype

    # ---------------- attention branch ----------------
    xn = _layernorm_f32(x, ln1_g_ref[...], ln1_b_ref[...])                 # (S, D) f32
    qkv = jnp.dot(xn.astype(mxu), w_qkv_ref[...],
                  preferred_element_type=jnp.float32) + b_qkv_ref[...]     # (S, 3D) f32

    q = qkv[:, :d_model] * scale             # scale fused once into q
    k = qkv[:, d_model:2 * d_model]
    v = qkv[:, 2 * d_model:]

    def to_heads(t):                          # (S, D) -> (H, S, Dh), single relayout
        return jnp.transpose(t.reshape(S, n_head, head_dim), (1, 0, 2))

    qh = to_heads(q).astype(mxu)
    kh = to_heads(k).astype(mxu)
    vh = to_heads(v).astype(mxu)

    # scores: (H, S, S) — heads handled as a dot_general batch dim (one MXU pass)
    s = jax.lax.dot_general(
        qh, kh, (((2,), (2,)), ((0,), (0,))),
        preferred_element_type=jnp.float32)
    s = s - jnp.max(s, axis=-1, keepdims=True)
    p = jnp.exp(s)
    denom = jnp.sum(p, axis=-1, keepdims=True)
    p = p * pl.reciprocal(denom, approx=True)          # EUP reciprocal, no divide

    o = jax.lax.dot_general(
        p.astype(mxu), vh, (((2,), (1,)), ((0,), (0,))),
        preferred_element_type=jnp.float32)            # (H, S, Dh)
    attn = jnp.transpose(o, (1, 0, 2)).reshape(S, d_model)                 # (S, D)

    attn = jnp.dot(attn.astype(mxu), w_o_ref[...],
                   preferred_element_type=jnp.float32) + b_o_ref[...]
    x = x + attn.astype(x.dtype)

    # ---------------- MLP branch ----------------
    xn2 = _layernorm_f32(x, ln2_g_ref[...], ln2_b_ref[...])
    h = jnp.dot(xn2.astype(mxu), w_fc_ref[...],
                preferred_element_type=jnp.float32) + b_fc_ref[...]        # (S, 4D) f32
    h = h * jax.nn.sigmoid(1.702 * h)                  # QuickGELU (EUP sigmoid)
    mlp = jnp.dot(h.astype(mxu), w_proj_ref[...],
                  preferred_element_type=jnp.float32) + b_proj_ref[...]

    out_ref[...] = (x + mlp.astype(x.dtype)).astype(out_ref.dtype)


def residual_attention_block(x_sbd, params, n_head):
    """x_sbd: (seq, batch, d_model), matching the PyTorch module's input layout."""
    S, B, D = x_sbd.shape
    (ln1_g, ln1_b, w_qkv, b_qkv, w_o, b_o,
     ln2_g, ln2_b, w_fc, b_fc, w_proj, b_proj) = params

    # Weights live in VMEM as bf16 (MXU operands); biases / LN params stay f32.
    kernel_params = (
        ln1_g, ln1_b,
        w_qkv.astype(jnp.bfloat16), b_qkv,
        w_o.astype(jnp.bfloat16), b_o,
        ln2_g, ln2_b,
        w_fc.astype(jnp.bfloat16), b_fc,
        w_proj.astype(jnp.bfloat16), b_proj,
    )

    x = jnp.transpose(x_sbd, (1, 0, 2))                # -> (B, S, D) for the kernel

    kernel = partial(residual_attention_block_kernel, d_model=D, n_head=n_head)

    def full_spec(shape):
        # Whole parameter resident in VMEM; grid-invariant index_map -> fetched
        # once, no per-step refetch.
        return pl.BlockSpec(shape, lambda b: tuple(0 for _ in shape))

    param_specs = [
        full_spec((1, D)), full_spec((1, D)),            # ln1 gamma / beta
        full_spec((D, 3 * D)), full_spec((1, 3 * D)),    # in_proj
        full_spec((D, D)), full_spec((1, D)),            # out_proj
        full_spec((1, D)), full_spec((1, D)),            # ln2 gamma / beta
        full_spec((D, 4 * D)), full_spec((1, 4 * D)),    # mlp.c_fc
        full_spec((4 * D, D)), full_spec((1, D)),        # mlp.c_proj
    ]

    # Explicit VMEM budget from the actual working set (with headroom), clamped
    # to a range that is safe on v5e/v6e/v7x.
    itemsize = x_sbd.dtype.itemsize
    n_h = n_head
    weight_bytes = 2 * (12 * D * D * 2 + 16 * D * 4)             # double-buffered params
    act_bytes = 2 * 2 * S * D * itemsize                          # in/out tiles, 2 buffers
    interm_bytes = (S * 3 * D + 3 * S * D + 2 * n_h * S * S + 5 * S * D) * 4
    vmem_limit = min(max(weight_bytes + act_bytes + interm_bytes + (8 << 20),
                         32 << 20), 64 << 20)

    flops = int(B * (24 * S * D * D + 4 * S * S * D))
    transcendentals = int(B * (n_h * S * S + 4 * S * D + 2 * S))
    bytes_accessed = int(12 * D * D * 2 + 16 * D * 4 + 2 * B * S * D * itemsize)

    out = pl.pallas_call(
        kernel,
        out_shape=jax.ShapeDtypeStruct((B, S, D), x.dtype),
        grid_spec=pltpu.PrefetchScalarGridSpec(
            num_scalar_prefetch=0,
            grid=(B,),
            in_specs=[pl.BlockSpec((None, S, D), lambda b: (b, 0, 0))] + param_specs,
            out_specs=pl.BlockSpec((None, S, D), lambda b: (b, 0, 0)),
        ),
        compiler_params=pltpu.CompilerParams(
            dimension_semantics=("parallel",),
            vmem_limit_bytes=int(vmem_limit),
        ),
        cost_estimate=pl.CostEstimate(
            flops=flops,
            transcendentals=transcendentals,
            bytes_accessed=bytes_accessed,
        ),
    )(x, *kernel_params)

    return jnp.transpose(out, (1, 0, 2))               # back to (S, B, D)


def make_params(key, d_model):
    """Deterministic synthetic parameters with the shapes nn.MultiheadAttention /
    nn.Linear would create.  Weights are pre-transposed so kernels compute x @ W."""
    ks = jax.random.split(key, 6)
    s = 0.02
    D = d_model
    ln1_g = jnp.ones((1, D), jnp.float32)
    ln1_b = jnp.zeros((1, D), jnp.float32)
    w_in = jax.random.normal(ks[0], (3 * D, D), jnp.float32) * s    # in_proj_weight (3D, D)
    b_in = jax.random.normal(ks[1], (3 * D,), jnp.float32) * s
    w_out = jax.random.normal(ks[2], (D, D), jnp.float32) * s       # out_proj.weight (D, D)
    b_out = jax.random.normal(ks[3], (D,), jnp.float32) * s
    ln2_g = jnp.ones((1, D), jnp.float32)
    ln2_b = jnp.zeros((1, D), jnp.float32)
    w_fc = jax.random.normal(ks[4], (4 * D, D), jnp.float32) * s    # c_fc.weight (4D, D)
    b_fc = jnp.zeros((4 * D,), jnp.float32) + 0.01
    w_pr = jax.random.normal(ks[5], (D, 4 * D), jnp.float32) * s    # c_proj.weight (D, 4D)
    b_pr = jnp.zeros((D,), jnp.float32) - 0.01
    return (
        ln1_g, ln1_b,
        w_in.T, b_in[None, :],
        w_out.T, b_out[None, :],
        ln2_g, ln2_b,
        w_fc.T, b_fc[None, :],
        w_pr.T, b_pr[None, :],
    )


def reference(x, params, n_head):
    """Pure-JAX reference mirroring the PyTorch forward (layout (S, B, D))."""
    (ln1_g, ln1_b, w_qkv, b_qkv, w_o, b_o,
     ln2_g, ln2_b, w_fc, b_fc, w_proj, b_proj) = params
    S, B, D = x.shape
    Dh = D // n_head

    def ln(v, g, b):
        mu = v.mean(-1, keepdims=True)
        var = ((v - mu) ** 2).mean(-1, keepdims=True)
        return (v - mu) / jnp.sqrt(var + 1e-5) * g + b

    xn = ln(x, ln1_g[0], ln1_b[0])
    qkv = xn @ w_qkv + b_qkv[0]
    q, k, v = jnp.split(qkv, 3, axis=-1)

    def heads(t):  # (S, B, D) -> (B, H, S, Dh)
        return t.reshape(S, B, n_head, Dh).transpose(1, 2, 0, 3)

    qh, kh, vh = heads(q), heads(k), heads(v)
    s = jnp.einsum('bhqd,bhkd->bhqk', qh / math.sqrt(Dh), kh)
    p = jax.nn.softmax(s, axis=-1)
    o = jnp.einsum('bhqk,bhkd->bhqd', p, vh)
    o = o.transpose(2, 0, 1, 3).reshape(S, B, D)
    x = x + (o @ w_o + b_o[0])

    xn2 = ln(x, ln2_g[0], ln2_b[0])
    h = xn2 @ w_fc + b_fc[0]
    h = h * jax.nn.sigmoid(1.702 * h)
    return x + (h @ w_proj + b_proj[0])


if __name__ == "__main__":
    # head_dim = 128 (lane-aligned) so the in-kernel head split/merge is a clean
    # tile-aligned relayout; shapes kept small.
    SEQ, BATCH, D_MODEL, N_HEAD = 8, 2, 256, 2

    key = jax.random.PRNGKey(0)
    kx, kp = jax.random.split(key)
    x = jax.random.normal(kx, (SEQ, BATCH, D_MODEL), jnp.float32)
    params = make_params(kp, D_MODEL)

    out = jax.block_until_ready(residual_attention_block(x, params, N_HEAD))

    ref = reference(x, params, N_HEAD)
    assert out.shape == (SEQ, BATCH, D_MODEL)
    # bf16 MXU operands in the kernel vs f32 reference -> loosened tolerance.
    err = float(jnp.max(jnp.abs(out - ref)))
    assert err < 2e-2, err

    print("KERNEL_OK")
</pallas_src>

<mosaic_0001>
module attributes {stable_mosaic.version = 11 : i64} {
  func.func @residual_attention_block_kernel(%arg0: i32, %arg1: memref<1x8x256xf32, #tpu.memory_space<vmem>>, %arg2: memref<1x256xf32, #tpu.memory_space<vmem>>, %arg3: memref<1x256xf32, #tpu.memory_space<vmem>>, %arg4: memref<256x768xbf16, #tpu.memory_space<vmem>>, %arg5: memref<1x768xf32, #tpu.memory_space<vmem>>, %arg6: memref<256x256xbf16, #tpu.memory_space<vmem>>, %arg7: memref<1x256xf32, #tpu.memory_space<vmem>>, %arg8: memref<1x256xf32, #tpu.memory_space<vmem>>, %arg9: memref<1x256xf32, #tpu.memory_space<vmem>>, %arg10: memref<256x1024xbf16, #tpu.memory_space<vmem>>, %arg11: memref<1x1024xf32, #tpu.memory_space<vmem>>, %arg12: memref<1024x256xbf16, #tpu.memory_space<vmem>>, %arg13: memref<1x256xf32, #tpu.memory_space<vmem>>, %arg14: memref<1x8x256xf32, #tpu.memory_space<vmem>>) attributes {dimension_semantics = [#tpu.dimension_semantics<parallel>], iteration_bounds = array<i64: 2>, scalar_prefetch = 0 : i64, scratch_operands = 0 : i64, tpu.core_type = #tpu.core_type<tc>, window_params = [{transform_indices = @transform_0, window_bounds = array<i64: 1, 8, 256>}, {pipeline_mode = #tpu.pipeline_mode<synchronous>, transform_indices = @transform_1, window_bounds = array<i64: 1, 256>}, {pipeline_mode = #tpu.pipeline_mode<synchronous>, transform_indices = @transform_2, window_bounds = array<i64: 1, 256>}, {pipeline_mode = #tpu.pipeline_mode<synchronous>, transform_indices = @transform_3, window_bounds = array<i64: 256, 768>}, {pipeline_mode = #tpu.pipeline_mode<synchronous>, transform_indices = @transform_4, window_bounds = array<i64: 1, 768>}, {pipeline_mode = #tpu.pipeline_mode<synchronous>, transform_indices = @transform_5, window_bounds = array<i64: 256, 256>}, {pipeline_mode = #tpu.pipeline_mode<synchronous>, transform_indices = @transform_6, window_bounds = array<i64: 1, 256>}, {pipeline_mode = #tpu.pipeline_mode<synchronous>, transform_indices = @transform_7, window_bounds = array<i64: 1, 256>}, {pipeline_mode = #tpu.pipeline_mode<synchronous>, transform_indices = @transform_8, window_bounds = array<i64: 1, 256>}, {pipeline_mode = #tpu.pipeline_mode<synchronous>, transform_indices = @transform_9, window_bounds = array<i64: 256, 1024>}, {pipeline_mode = #tpu.pipeline_mode<synchronous>, transform_indices = @transform_10, window_bounds = array<i64: 1, 1024>}, {pipeline_mode = #tpu.pipeline_mode<synchronous>, transform_indices = @transform_11, window_bounds = array<i64: 1024, 256>}, {pipeline_mode = #tpu.pipeline_mode<synchronous>, transform_indices = @transform_12, window_bounds = array<i64: 1, 256>}, {transform_indices = @transform_13, window_bounds = array<i64: 1, 8, 256>}]} {
    %c0 = arith.constant 0 : index
    %c0_0 = arith.constant 0 : index
    %c0_1 = arith.constant 0 : index
    %0 = vector.load %arg1[%c0, %c0_0, %c0_1] : memref<1x8x256xf32, #tpu.memory_space<vmem>>, vector<1x8x256xf32>
    %1 = vector.shape_cast %0 : vector<1x8x256xf32> to vector<8x256xf32>
    %c0_2 = arith.constant 0 : index
    %c0_3 = arith.constant 0 : index
    %2 = vector.load %arg2[%c0_2, %c0_3] : memref<1x256xf32, #tpu.memory_space<vmem>>, vector<1x256xf32>
    %c0_4 = arith.constant 0 : index
    %c0_5 = arith.constant 0 : index
    %3 = vector.load %arg3[%c0_4, %c0_5] : memref<1x256xf32, #tpu.memory_space<vmem>>, vector<1x256xf32>
    %cst = arith.constant dense<0.000000e+00> : vector<8xf32>
    %4 = vector.multi_reduction <add>, %1, %cst [1] : vector<8x256xf32> to vector<8xf32>
    %5 = vector.shape_cast %4 : vector<8xf32> to vector<8x1xf32>
    %cst_6 = arith.constant 2.560000e+02 : f32
    %6 = vector.broadcast %cst_6 : f32 to vector<8x1xf32>
    %7 = arith.divf %5, %6 : vector<8x1xf32>
    %8 = vector.broadcast %7 : vector<8x1xf32> to vector<8x256xf32>
    %9 = arith.subf %1, %8 : vector<8x256xf32>
    %10 = arith.mulf %9, %9 : vector<8x256xf32>
    %cst_7 = arith.constant dense<0.000000e+00> : vector<8xf32>
    %11 = vector.multi_reduction <add>, %10, %cst_7 [1] : vector<8x256xf32> to vector<8xf32>
    %12 = vector.shape_cast %11 : vector<8xf32> to vector<8x1xf32>
    %cst_8 = arith.constant 2.560000e+02 : f32
    %13 = vector.broadcast %cst_8 : f32 to vector<8x1xf32>
    %14 = arith.divf %12, %13 : vector<8x1xf32>
    %cst_9 = arith.constant 9.99999974E-6 : f32
    %15 = vector.broadcast %cst_9 : f32 to vector<8x1xf32>
    %16 = arith.addf %14, %15 : vector<8x1xf32>
    %17 = math.rsqrt %16 : vector<8x1xf32>
    %18 = vector.broadcast %17 : vector<8x1xf32> to vector<8x256xf32>
    %19 = arith.mulf %9, %18 : vector<8x256xf32>
    %20 = vector.broadcast %2 : vector<1x256xf32> to vector<8x256xf32>
    %21 = arith.mulf %19, %20 : vector<8x256xf32>
    %22 = vector.broadcast %3 : vector<1x256xf32> to vector<8x256xf32>
    %23 = arith.addf %21, %22 : vector<8x256xf32>
    %24 = arith.truncf %23 : vector<8x256xf32> to vector<8x256xbf16>
    %c0_10 = arith.constant 0 : index
    %c0_11 = arith.constant 0 : index
    %25 = vector.load %arg4[%c0_10, %c0_11] : memref<256x768xbf16, #tpu.memory_space<vmem>>, vector<256x768xbf16>
    %cst_12 = arith.constant dense<0.000000e+00> : vector<8x768xf32>
    %26 = tpu.matmul %24, %25, %cst_12 {dimension_numbers = #tpu.dot_dimension_numbers<[1], [0], [0], [1], [0, 0, 1, 1], [], []>} : vector<8x256xbf16>, vector<256x768xbf16>, vector<8x768xf32> -> vector<8x768xf32>
    %c0_13 = arith.constant 0 : index
    %c0_14 = arith.constant 0 : index
    %27 = vector.load %arg5[%c0_13, %c0_14] : memref<1x768xf32, #tpu.memory_space<vmem>>, vector<1x768xf32>
    %28 = vector.broadcast %27 : vector<1x768xf32> to vector<8x768xf32>
    %29 = arith.addf %26, %28 : vector<8x768xf32>
    %30 = vector.extract_strided_slice %29 {offsets = [0, 0], sizes = [8, 256], strides = [1, 1]} : vector<8x768xf32> to vector<8x256xf32>
    %cst_15 = arith.constant 0.0883883461 : f32
    %31 = vector.broadcast %cst_15 : f32 to vector<8x256xf32>
    %32 = arith.mulf %30, %31 : vector<8x256xf32>
    %33 = vector.extract_strided_slice %29 {offsets = [0, 256], sizes = [8, 256], strides = [1, 1]} : vector<8x768xf32> to vector<8x256xf32>
    %34 = vector.extract_strided_slice %29 {offsets = [0, 512], sizes = [8, 256], strides = [1, 1]} : vector<8x768xf32> to vector<8x256xf32>
    %35 = vector.shape_cast %32 : vector<8x256xf32> to vector<8x2x128xf32>
    %36 = tpu.transpose %35, [1, 0, 2] : vector<8x2x128xf32> -> vector<2x8x128xf32>
    %37 = arith.truncf %36 : vector<2x8x128xf32> to vector<2x8x128xbf16>
    %38 = vector.shape_cast %33 : vector<8x256xf32> to vector<8x2x128xf32>
    %39 = tpu.transpose %38, [1, 0, 2] : vector<8x2x128xf32> -> vector<2x8x128xf32>
    %40 = arith.truncf %39 : vector<2x8x128xf32> to vector<2x8x128xbf16>
    %41 = vector.shape_cast %34 : vector<8x256xf32> to vector<8x2x128xf32>
    %42 = tpu.transpose %41, [1, 0, 2] : vector<8x2x128xf32> -> vector<2x8x128xf32>
    %43 = arith.truncf %42 : vector<2x8x128xf32> to vector<2x8x128xbf16>
    %cst_16 = arith.constant dense<0.000000e+00> : vector<2x8x8xf32>
    %44 = tpu.matmul %37, %40, %cst_16 {dimension_numbers = #tpu.dot_dimension_numbers<[2], [2], [1], [1], [0, 0, 0, 1, 1, 1], [0], [0]>} : vector<2x8x128xbf16>, vector<2x8x128xbf16>, vector<2x8x8xf32> -> vector<2x8x8xf32>
    %cst_17 = arith.constant dense<0xFF800000> : vector<2x8xf32>
    %45 = vector.multi_reduction <maximumf>, %44, %cst_17 [2] : vector<2x8x8xf32> to vector<2x8xf32>
    %46 = vector.shape_cast %45 : vector<2x8xf32> to vector<2x8x1xf32>
    %47 = vector.broadcast %46 : vector<2x8x1xf32> to vector<2x8x8xf32>
    %48 = arith.subf %44, %47 : vector<2x8x8xf32>
    %49 = math.exp %48 : vector<2x8x8xf32>
    %cst_18 = arith.constant dense<0.000000e+00> : vector<2x8xf32>
    %50 = vector.multi_reduction <add>, %49, %cst_18 [2] : vector<2x8x8xf32> to vector<2x8xf32>
    %51 = vector.shape_cast %50 : vector<2x8xf32> to vector<2x8x1xf32>
    %52 = tpu.reciprocal %51 {approx = true} : vector<2x8x1xf32> -> vector<2x8x1xf32>
    %53 = vector.broadcast %52 : vector<2x8x1xf32> to vector<2x8x8xf32>
    %54 = arith.mulf %49, %53 : vector<2x8x8xf32>
    %55 = arith.truncf %54 : vector<2x8x8xf32> to vector<2x8x8xbf16>
    %cst_19 = arith.constant dense<0.000000e+00> : vector<2x8x128xf32>
    %56 = tpu.matmul %55, %43, %cst_19 {dimension_numbers = #tpu.dot_dimension_numbers<[2], [1], [1], [2], [0, 0, 0, 1, 1, 2], [0], [0]>} : vector<2x8x8xbf16>, vector<2x8x128xbf16>, vector<2x8x128xf32> -> vector<2x8x128xf32>
    %57 = tpu.transpose %56, [1, 0, 2] : vector<2x8x128xf32> -> vector<8x2x128xf32>
    %58 = vector.shape_cast %57 : vector<8x2x128xf32> to vector<8x256xf32>
    %59 = arith.truncf %58 : vector<8x256xf32> to vector<8x256xbf16>
    %c0_20 = arith.constant 0 : index
    %c0_21 = arith.constant 0 : index
    %60 = vector.load %arg6[%c0_20, %c0_21] : memref<256x256xbf16, #tpu.memory_space<vmem>>, vector<256x256xbf16>
    %cst_22 = arith.constant dense<0.000000e+00> : vector<8x256xf32>
    %61 = tpu.matmul %59, %60, %cst_22 {dimension_numbers = #tpu.dot_dimension_numbers<[1], [0], [0], [1], [0, 0, 1, 1], [], []>} : vector<8x256xbf16>, vector<256x256xbf16>, vector<8x256xf32> -> vector<8x256xf32>
    %c0_23 = arith.constant 0 : index
    %c0_24 = arith.constant 0 : index
    %62 = vector.load %arg7[%c0_23, %c0_24] : memref<1x256xf32, #tpu.memory_space<vmem>>, vector<1x256xf32>
    %63 = vector.broadcast %62 : vector<1x256xf32> to vector<8x256xf32>
    %64 = arith.addf %61, %63 : vector<8x256xf32>
    %65 = arith.addf %1, %64 : vector<8x256xf32>
    %c0_25 = arith.constant 0 : index
    %c0_26 = arith.constant 0 : index
    %66 = vector.load %arg8[%c0_25, %c0_26] : memref<1x256xf32, #tpu.memory_space<vmem>>, vector<1x256xf32>
    %c0_27 = arith.constant 0 : index
    %c0_28 = arith.constant 0 : index
    %67 = vector.load %arg9[%c0_27, %c0_28] : memref<1x256xf32, #tpu.memory_space<vmem>>, vector<1x256xf32>
    %cst_29 = arith.constant dense<0.000000e+00> : vector<8xf32>
    %68 = vector.multi_reduction <add>, %65, %cst_29 [1] : vector<8x256xf32> to vector<8xf32>
    %69 = vector.shape_cast %68 : vector<8xf32> to vector<8x1xf32>
    %cst_30 = arith.constant 2.560000e+02 : f32
    %70 = vector.broadcast %cst_30 : f32 to vector<8x1xf32>
    %71 = arith.divf %69, %70 : vector<8x1xf32>
    %72 = vector.broadcast %71 : vector<8x1xf32> to vector<8x256xf32>
    %73 = arith.subf %65, %72 : vector<8x256xf32>
    %74 = arith.mulf %73, %73 : vector<8x256xf32>
    %cst_31 = arith.constant dense<0.000000e+00> : vector<8xf32>
    %75 = vector.multi_reduction <add>, %74, %cst_31 [1] : vector<8x256xf32> to vector<8xf32>
    %76 = vector.shape_cast %75 : vector<8xf32> to vector<8x1xf32>
    %cst_32 = arith.constant 2.560000e+02 : f32
    %77 = vector.broadcast %cst_32 : f32 to vector<8x1xf32>
    %78 = arith.divf %76, %77 : vector<8x1xf32>
    %cst_33 = arith.constant 9.99999974E-6 : f32
    %79 = vector.broadcast %cst_33 : f32 to vector<8x1xf32>
    %80 = arith.addf %78, %79 : vector<8x1xf32>
    %81 = math.rsqrt %80 : vector<8x1xf32>
    %82 = vector.broadcast %81 : vector<8x1xf32> to vector<8x256xf32>
    %83 = arith.mulf %73, %82 : vector<8x256xf32>
    %84 = vector.broadcast %66 : vector<1x256xf32> to vector<8x256xf32>
    %85 = arith.mulf %83, %84 : vector<8x256xf32>
    %86 = vector.broadcast %67 : vector<1x256xf32> to vector<8x256xf32>
    %87 = arith.addf %85, %86 : vector<8x256xf32>
    %88 = arith.truncf %87 : vector<8x256xf32> to vector<8x256xbf16>
    %c0_34 = arith.constant 0 : index
    %c0_35 = arith.constant 0 : index
    %89 = vector.load %arg10[%c0_34, %c0_35] : memref<256x1024xbf16, #tpu.memory_space<vmem>>, vector<256x1024xbf16>
    %cst_36 = arith.constant dense<0.000000e+00> : vector<8x1024xf32>
    %90 = tpu.matmul %88, %89, %cst_36 {dimension_numbers = #tpu.dot_dimension_numbers<[1], [0], [0], [1], [0, 0, 1, 1], [], []>} : vector<8x256xbf16>, vector<256x1024xbf16>, vector<8x1024xf32> -> vector<8x1024xf32>
    %c0_37 = arith.constant 0 : index
    %c0_38 = arith.constant 0 : index
    %91 = vector.load %arg11[%c0_37, %c0_38] : memref<1x1024xf32, #tpu.memory_space<vmem>>, vector<1x1024xf32>
    %92 = vector.broadcast %91 : vector<1x1024xf32> to vector<8x1024xf32>
    %93 = arith.addf %90, %92 : vector<8x1024xf32>
    %cst_39 = arith.constant 1.702000e+00 : f32
    %94 = vector.broadcast %cst_39 : f32 to vector<8x1024xf32>
    %95 = arith.mulf %94, %93 : vector<8x1024xf32>
    %96 = arith.negf %95 : vector<8x1024xf32>
    %97 = math.exp %96 : vector<8x1024xf32>
    %cst_40 = arith.constant 1.000000e+00 : f32
    %98 = vector.broadcast %cst_40 : f32 to vector<8x1024xf32>
    %99 = arith.addf %98, %97 : vector<8x1024xf32>
    %100 = arith.divf %98, %99 : vector<8x1024xf32>
    %101 = arith.mulf %93, %100 : vector<8x1024xf32>
    %102 = arith.truncf %101 : vector<8x1024xf32> to vector<8x1024xbf16>
    %c0_41 = arith.constant 0 : index
    %c0_42 = arith.constant 0 : index
    %103 = vector.load %arg12[%c0_41, %c0_42] : memref<1024x256xbf16, #tpu.memory_space<vmem>>, vector<1024x256xbf16>
    %cst_43 = arith.constant dense<0.000000e+00> : vector<8x256xf32>
    %104 = tpu.matmul %102, %103, %cst_43 {dimension_numbers = #tpu.dot_dimension_numbers<[1], [0], [0], [1], [0, 0, 1, 1], [], []>} : vector<8x1024xbf16>, vector<1024x256xbf16>, vector<8x256xf32> -> vector<8x256xf32>
    %c0_44 = arith.constant 0 : index
    %c0_45 = arith.constant 0 : index
    %105 = vector.load %arg13[%c0_44, %c0_45] : memref<1x256xf32, #tpu.memory_space<vmem>>, vector<1x256xf32>
    %106 = vector.broadcast %105 : vector<1x256xf32> to vector<8x256xf32>
    %107 = arith.addf %104, %106 : vector<8x256xf32>
    %108 = arith.addf %65, %107 : vector<8x256xf32>
    %c0_46 = arith.constant 0 : index
    %c0_47 = arith.constant 0 : index
    %c0_48 = arith.constant 0 : index
    %109 = vector.load %arg14[%c0_46, %c0_47, %c0_48] : memref<1x8x256xf32, #tpu.memory_space<vmem>>, vector<1x8x256xf32>
    %110 = vector.shape_cast %109 : vector<1x8x256xf32> to vector<8x256xf32>
    %111 = vector.shape_cast %108 : vector<8x256xf32> to vector<1x8x256xf32>
    tpu.vector_store %arg14[%c0_46, %c0_47, %c0_48], %111 {strides = array<i32>} : memref<1x8x256xf32, #tpu.memory_space<vmem>>, vector<1x8x256xf32>,
    return
  }
  func.func @transform_0(%arg0: i32) -> (i32, i32, i32) {
    %c0_i32 = arith.constant 0 : i32
    %c0_i32_0 = arith.constant 0 : i32
    %c0_i32_1 = arith.constant 0 : i32
    return %arg0, %c0_i32, %c0_i32_0 : i32, i32, i32
  }
  func.func @transform_1(%arg0: i32) -> (i32, i32) {
    %c0_i32 = arith.constant 0 : i32
    %c0_i32_0 = arith.constant 0 : i32
    %c0_i32_1 = arith.constant 0 : i32
    return %c0_i32, %c0_i32_0 : i32, i32
  }
  func.func @transform_2(%arg0: i32) -> (i32, i32) {
    %c0_i32 = arith.constant 0 : i32
    %c0_i32_0 = arith.constant 0 : i32
    %c0_i32_1 = arith.constant 0 : i32
    return %c0_i32, %c0_i32_0 : i32, i32
  }
  func.func @transform_3(%arg0: i32) -> (i32, i32) {
    %c0_i32 = arith.constant 0 : i32
    %c0_i32_0 = arith.constant 0 : i32
    %c0_i32_1 = arith.constant 0 : i32
    return %c0_i32, %c0_i32_0 : i32, i32
  }
  func.func @transform_4(%arg0: i32) -> (i32, i32) {
    %c0_i32 = arith.constant 0 : i32
    %c0_i32_0 = arith.constant 0 : i32
    %c0_i32_1 = arith.constant 0 : i32
    return %c0_i32, %c0_i32_0 : i32, i32
  }
  func.func @transform_5(%arg0: i32) -> (i32, i32) {
    %c0_i32 = arith.constant 0 : i32
    %c0_i32_0 = arith.constant 0 : i32
    %c0_i32_1 = arith.constant 0 : i32
    return %c0_i32, %c0_i32_0 : i32, i32
  }
  func.func @transform_6(%arg0: i32) -> (i32, i32) {
    %c0_i32 = arith.constant 0 : i32
    %c0_i32_0 = arith.constant 0 : i32
    %c0_i32_1 = arith.constant 0 : i32
    return %c0_i32, %c0_i32_0 : i32, i32
  }
  func.func @transform_7(%arg0: i32) -> (i32, i32) {
    %c0_i32 = arith.constant 0 : i32
    %c0_i32_0 = arith.constant 0 : i32
    %c0_i32_1 = arith.constant 0 : i32
    return %c0_i32, %c0_i32_0 : i32, i32
  }
  func.func @transform_8(%arg0: i32) -> (i32, i32) {
    %c0_i32 = arith.constant 0 : i32
    %c0_i32_0 = arith.constant 0 : i32
    %c0_i32_1 = arith.constant 0 : i32
    return %c0_i32, %c0_i32_0 : i32, i32
  }
  func.func @transform_9(%arg0: i32) -> (i32, i32) {
    %c0_i32 = arith.constant 0 : i32
    %c0_i32_0 = arith.constant 0 : i32
    %c0_i32_1 = arith.constant 0 : i32
    return %c0_i32, %c0_i32_0 : i32, i32
  }
  func.func @transform_10(%arg0: i32) -> (i32, i32) {
    %c0_i32 = arith.constant 0 : i32
    %c0_i32_0 = arith.constant 0 : i32
    %c0_i32_1 = arith.constant 0 : i32
    return %c0_i32, %c0_i32_0 : i32, i32
  }
  func.func @transform_11(%arg0: i32) -> (i32, i32) {
    %c0_i32 = arith.constant 0 : i32
    %c0_i32_0 = arith.constant 0 : i32
    %c0_i32_1 = arith.constant 0 : i32
    return %c0_i32, %c0_i32_0 : i32, i32
  }
  func.func @transform_12(%arg0: i32) -> (i32, i32) {
    %c0_i32 = arith.constant 0 : i32
    %c0_i32_0 = arith.constant 0 : i32
    %c0_i32_1 = arith.constant 0 : i32
    return %c0_i32, %c0_i32_0 : i32, i32
  }
  func.func @transform_13(%arg0: i32) -> (i32, i32, i32) {
    %c0_i32 = arith.constant 0 : i32
    %c0_i32_0 = arith.constant 0 : i32
    %c0_i32_1 = arith.constant 0 : i32
    return %arg0, %c0_i32, %c0_i32_0 : i32, i32, i32
  }
}

</mosaic_0001>

<bundles_post_ra>
// kernel: tpu_custom_call.1
= control target key start
LH: loop header
LB: loop body
LE: loop exit
PB: predicated region body
PF: predicated region fallthrough
CT: control target
= control target key end

     0   :  { %s6355_s0 = inlined_call_operand.hbm [shape: f32[2,8,256], index: 0, kind: input, shape index: {}]   ;;  %s6356_s1 = inlined_call_operand.hbm [shape: f32[1,256], index: 1, kind: input, shape index: {}]   ;;  %s6357_s2 = inlined_call_operand.hbm [shape: f32[1,256], index: 2, kind: input, shape index: {}]   ;;  %s6358_s3 = inlined_call_operand.hbm [shape: bf16[256,768], index: 3, kind: input, shape index: {}]   ;;  %s6359_s4 = inlined_call_operand.vmem [shape: f32[1,768], index: 4, kind: input, shape index: {}]   ;;  %s6360_s5 = inlined_call_operand.hbm [shape: bf16[256,256], index: 5, kind: input, shape index: {}]   ;;  %s6361_s6 = inlined_call_operand.vmem [shape: f32[1,256], index: 6, kind: input, shape index: {}]   ;;  %s6362_s7 = inlined_call_operand.vmem [shape: f32[1,256], index: 7, kind: input, shape index: {}]   ;;  %s6363_s8 = inlined_call_operand.vmem [shape: f32[1,256], index: 8, kind: input, shape index: {}]   ;;  %s6364_s9 = inlined_call_operand.hbm [shape: bf16[256,1024], index: 9, kind: input, shape index: {}]   ;;  %s6365_s10 = inlined_call_operand.vmem [shape: f32[1,1024], index: 10, kind: input, shape index: {}]   ;;  %s6366_s11 = inlined_call_operand.hbm [shape: bf16[1024,256], index: 11, kind: input, shape index: {}]   ;;  %s6367_s12 = inlined_call_operand.vmem [shape: f32[1,256], index: 12, kind: input, shape index: {}]   ;;  %s6368_s13 = inlined_call_operand.hbm [shape: f32[2,8,256], index: 13, kind: output, shape index: {}]  }
   0x1   :  { %6373 = sst [smem:[#allocation20_spill]] %s6356_s1 }
   0x2   :  { %6374 = sst [smem:[#allocation21_spill]] %s6358_s3 }
   0x3   :  { %6375 = sst [smem:[#allocation22_spill]] %s6362_s7 }
   0x4   :  { %6376 = sst [smem:[#allocation23_spill]] %s6363_s8 }
   0x5   :  { %6377 = sst [smem:[#allocation24_spill]] %s6365_s10 }
   0x6   :  { %6378 = sst [smem:[#allocation25_spill]] %s6367_s12 }
   0x7   :  { %6379 = sst [smem:[#allocation26_spill]] %s6368_s13 }
   0x8   :  { %18 = vsyncpa [#allocation3], 0 }
   0x9   :  { %20 = vsyncpa [#allocation3 + $0x1], 0 }
   0xa   :  { %21 = vsyncpa [#allocation6], 0 }
   0xb   :  { %22 = vsyncpa [#allocation9], 0 }
   0xc   :  { %23 = vsyncpa [#allocation12], 0 }
   0xd   :  { %24 = vsyncpa [#allocation4], 0 }
   0xe   :  { %26 = vsyncpa [#allocation4 + $0x1], 0  ;;  %s5797_s25 = smov 0   ;;  %s5799_s26 = smov 0  }
   0xf   :  { %s5801_s27 = smov 0   ;;  %s5803_s28 = smov 0  }
  0x10 LB: > { %s5709_s29 = smov [#allocation5]   ;;  %s5818_s14 = sadd.s32 4294967295, %s5707_s28   ;;  %s5707_s28 = sphi %s5803_s28, %s6409_s28   ;;  %s5703_s27 = sphi %s5801_s27, %s6408_s27   ;;  %s5699_s26 = sphi %s5799_s26, %s6407_s26   ;;  %s5695_s25 = sphi %s5797_s25, %s6406_s25  }
  0x11   : > { %s354_s30 = sshll.u32 %s5709_s29, 4  ;;  %p4423_p0 = scmp.ge.s32.totalorder %s5707_s28, 1  ;;  %s355_s30 = int_to_ptr.vmem [resolvable:$true] %s354_s30 }
  0x12   : > { %p6370_p1 = scmp.eq.s32.totalorder %s5818_s14, 0  ;;  %p341_p2 = scmp.lt.s32.totalorder %s5707_s28, 3 }
  0x13   : > { %s5710_s16 = smov [#allocation8]   ;;  %s5711_s19 = smov [#allocation11]  }
  0x14   : > { %p5823_p3 = pnand %p4423_p0, %p341_p2  ;;  %s375_s17 = sshll.u32 %s5710_s16, 4  ;;  %s5830_s17 = int_to_ptr.vmem [resolvable:$true] %s375_s17 }
  0x15   : > { %s413_s20 = sshll.u32 %s5711_s19, 4  ;;  %s6382_s1 = sld [smem:[#allocation20_spill]]  ;;  %s5838_s20 = int_to_ptr.vmem [resolvable:$true] %s413_s20 }
  0x16   : > { %s6380_s15 = scalar_select %p5823_p3, 1, 0 }
  0x17   : > { %p4912_p5 = pneg %p5823_p3 }
  0x19   : > { %p5834_p6 = pnand %p4912_p5, %p6370_p1 }
  0x1b   : > { %s5431_s23 = scalar_lea.hbm %s6382_s1, 32  ;;  %p5848_p8 = pneg %p5834_p6 }
  0x1c   : > { %p5432_p7 = scmp.ne.s32.totalorder %s6382_s1, %s5431_s23  ;;  %p5438_p11 = scmp.lt.u32.totalorder %s5431_s23, %s6382_s1 }
  0x1e   : > { %p5434_p9 = pnand %p5848_p8, %p5432_p7 }
  0x20   : > { %p5435_p10 = pneg %p5434_p9 }
  0x22   : > { %p5440_p12 = pnand %p5438_p11, %p5435_p10 }
  0x24   : > { %5443 = shalt.err (!%p5440_p12)
}
  0x25   : > { %s5444_s21 = scalar_lea.vmem %s355_s30, 32  ;;  %p5452_p5 = scmp.lt.s32.totalorder %s355_s30, %s355_s30 }
  0x26   : > { %p5445_p13 = scmp.ne.s32.totalorder %s355_s30, %s5444_s21  ;;  %p5453_p4 = scmp.lt.s32.totalorder %s5444_s21, %s5444_s21 }
  0x28   : > { %p5447_p0 = pnand %p5445_p13, %p5848_p8  ;;  %p5454_p1 = por %p5453_p4, %p5452_p5 }
  0x2a   : > { %p5448_p2 = pneg %p5447_p0 }
  0x2c   : > { %p5455_p3 = pnand %p5454_p1, %p5448_p2 }
  0x2e   : > { %5458 = shalt.err (!%p5455_p3)
}
  0x2f   : > { %4915 = dma.hbm_to_vmem [thread:$0]  (!%p5834_p6), %s6382_s1, 32, %s355_s30, [#allocation6]  }
  0x30   : > { %s6384_s3 = sld [smem:[#allocation21_spill]] }
  0x36   : > { %s5459_s29 = scalar_lea.hbm %s6384_s3, 12288 }
  0x37   : > { %p5460_p7 = scmp.ne.s32.totalorder %s6384_s3, %s5459_s29  ;;  %p5466_p1 = scmp.lt.u32.totalorder %s5459_s29, %s6384_s3 }
  0x39   : > { %p5462_p9 = pnand %p5460_p7, %p5848_p8 }
  0x3b   : > { %p5463_p4 = pneg %p5462_p9 }
  0x3d   : > { %p5468_p3 = pnand %p5466_p1, %p5463_p4 }
  0x3f   : > { %5471 = shalt.err (!%p5468_p3)
}
  0x40   : > { %s5472_s30 = scalar_lea.vmem %s5830_s17, 12288  ;;  %p5480_p13 = scmp.lt.s32.totalorder %s5830_s17, %s5830_s17 }
  0x41   : > { %p5473_p10 = scmp.ne.s32.totalorder %s5830_s17, %s5472_s30  ;;  %p5481_p0 = scmp.lt.s32.totalorder %s5472_s30, %s5472_s30 }
  0x43   : > { %p5475_p11 = pnand %p5473_p10, %p5848_p8  ;;  %p5482_p2 = por %p5481_p0, %p5480_p13 }
  0x45   : > { %p5476_p12 = pneg %p5475_p11 }
  0x47   : > { %p5483_p5 = pnand %p5482_p2, %p5476_p12 }
  0x49   : > { %5486 = shalt.err (!%p5483_p5)
}
  0x4a   : > { %s5712_s12 = smov 384   ;;  %s5713_s10 = smov 24  }
  0x4b   : > { %4921 = dma.hbm_to_vmem [thread:$0]  (!%p5834_p6), %s6384_s3, 12288, %s5830_s17, [#allocation9], %s5712_s12, %s5712_s12, %s5713_s10  }
  0x4c   : > { %s5487_s29 = scalar_lea.hbm %s6364_s9, 16384 }
  0x4d   : > { %p5488_p7 = scmp.ne.s32.totalorder %s6364_s9, %s5487_s29  ;;  %p5494_p1 = scmp.lt.u32.totalorder %s5487_s29, %s6364_s9 }
  0x4f   : > { %p5490_p9 = pnand %p5488_p7, %p5848_p8 }
  0x51   : > { %p5491_p4 = pneg %p5490_p9 }
  0x53   : > { %p5496_p3 = pnand %p5494_p1, %p5491_p4 }
  0x55   : > { %5499 = shalt.err (!%p5496_p3)
}
  0x56   : > { %s5500_s17 = scalar_lea.vmem %s5838_s20, 16384  ;;  %p5508_p13 = scmp.lt.s32.totalorder %s5838_s20, %s5838_s20 }
  0x57   : > { %p5501_p10 = scmp.ne.s32.totalorder %s5838_s20, %s5500_s17  ;;  %p5509_p0 = scmp.lt.s32.totalorder %s5500_s17, %s5500_s17 }
  0x59   : > { %p5503_p11 = pnand %p5501_p10, %p5848_p8  ;;  %p5510_p2 = por %p5509_p0, %p5508_p13 }
  0x5b   : > { %p5504_p12 = pneg %p5503_p11 }
  0x5d   : > { %p5511_p5 = pnand %p5510_p2, %p5504_p12 }
  0x5f   : > { %5514 = shalt.err (!%p5511_p5)
}
  0x60   : > { %s5714_s12 = smov 512   ;;  %s5715_s1 = smov 32  }
  0x61   : > { %4927 = dma.hbm_to_vmem [thread:$0]  (!%p5834_p6), %s6364_s9, 16384, %s5838_s20, [#allocation12], %s5714_s12, %s5714_s12, %s5715_s1  }
  0x62   : > { %s5716_s24 = smov [#allocation7]   ;;  %s5717_s23 = smov [#allocation10]  }
  0x63   : > { %s365_s13 = sshll.u32 %s5716_s24, 4  ;;  %s391_s29 = sshll.u32 %s5717_s23, 4  ;;  %s366_s13 = int_to_ptr.vmem [resolvable:$true] %s365_s13  ;;  %s392_s29 = int_to_ptr.vmem [resolvable:$true] %s391_s29 }
  0x64   : > { %s5515_s30 = scalar_lea.hbm %s6357_s2, 32 }
  0x65   : > { %p5516_p7 = scmp.ne.s32.totalorder %s6357_s2, %s5515_s30  ;;  %p5522_p1 = scmp.lt.u32.totalorder %s5515_s30, %s6357_s2 }
  0x67   : > { %p5518_p9 = pnand %p5516_p7, %p5848_p8 }
  0x69   : > { %p5519_p4 = pneg %p5518_p9 }
  0x6b   : > { %p5524_p3 = pnand %p5522_p1, %p5519_p4 }
  0x6d   : > { %5527 = shalt.err (!%p5524_p3)
}
  0x6e   : > { %s5528_s20 = scalar_lea.vmem %s366_s13, 32  ;;  %p5536_p13 = scmp.lt.s32.totalorder %s366_s13, %s366_s13 }
  0x6f   : > { %p5529_p10 = scmp.ne.s32.totalorder %s366_s13, %s5528_s20  ;;  %p5537_p0 = scmp.lt.s32.totalorder %s5528_s20, %s5528_s20 }
  0x71   : > { %p5531_p11 = pnand %p5529_p10, %p5848_p8  ;;  %p5538_p2 = por %p5537_p0, %p5536_p13 }
  0x73   : > { %p5532_p12 = pneg %p5531_p11 }
  0x75   : > { %p5539_p5 = pnand %p5538_p2, %p5532_p12 }
  0x77   : > { %5542 = shalt.err (!%p5539_p5)
}
  0x78   : > { %4918 = dma.hbm_to_vmem [thread:$0]  (!%p5834_p6), %s6357_s2, 32, %s366_s13, [#allocation6]  }
  0x79   : > { %s5543_s1 = scalar_lea.hbm %s6360_s5, 4096 }
  0x7a   : > { %p5544_p7 = scmp.ne.s32.totalorder %s6360_s5, %s5543_s1  ;;  %p5550_p1 = scmp.lt.u32.totalorder %s5543_s1, %s6360_s5 }
  0x7c   : > { %p5546_p9 = pnand %p5544_p7, %p5848_p8 }
  0x7e   : > { %p5547_p4 = pneg %p5546_p9 }
  0x80   : > { %p5552_p3 = pnand %p5550_p1, %p5547_p4 }
  0x82   : > { %5555 = shalt.err (!%p5552_p3)
}
  0x83   : > { %s5556_s19 = scalar_lea.vmem %s392_s29, 4096  ;;  %p5564_p13 = scmp.lt.s32.totalorder %s392_s29, %s392_s29 }
  0x84   : > { %p5557_p10 = scmp.ne.s32.totalorder %s392_s29, %s5556_s19  ;;  %p5565_p0 = scmp.lt.s32.totalorder %s5556_s19, %s5556_s19 }
  0x86   : > { %p5559_p11 = pnand %p5557_p10, %p5848_p8  ;;  %p5566_p2 = por %p5565_p0, %p5564_p13 }
  0x88   : > { %p5560_p12 = pneg %p5559_p11 }
  0x8a   : > { %p5567_p5 = pnand %p5566_p2, %p5560_p12 }
  0x8c   : > { %5570 = shalt.err (!%p5567_p5)
}
  0x8d   : > { %s5718_s13 = smov 128   ;;  %s5719_s21 = smov 8  }
  0x8e   : > { %4924 = dma.hbm_to_vmem [thread:$0]  (!%p5834_p6), %s6360_s5, 4096, %s392_s29, [#allocation9], %s5718_s13, %s5718_s13, %s5719_s21  }
  0x8f   : > { %s5720_s20 = smov [#allocation13]   ;;  %s5571_s8 = scalar_lea.hbm %s6366_s11, 16384 }
  0x90   : > { %s429_s3 = sshll.u32 %s5720_s20, 4  ;;  %p5572_p7 = scmp.ne.s32.totalorder %s6366_s11, %s5571_s8  ;;  %s430_s3 = int_to_ptr.vmem [resolvable:$true] %s429_s3 }
  0x91   : > { %p5578_p1 = scmp.lt.u32.totalorder %s5571_s8, %s6366_s11 }
  0x92   : > { %p5574_p9 = pnand %p5572_p7, %p5848_p8 }
  0x94   : > { %p5575_p4 = pneg %p5574_p9 }
  0x96   : > { %p5580_p3 = pnand %p5578_p1, %p5575_p4 }
  0x98   : > { %5583 = shalt.err (!%p5580_p3)
}
  0x99   : > { %s5584_s29 = scalar_lea.vmem %s430_s3, 16384  ;;  %p5592_p13 = scmp.lt.s32.totalorder %s430_s3, %s430_s3 }
  0x9a   : > { %p5585_p10 = scmp.ne.s32.totalorder %s430_s3, %s5584_s29  ;;  %p5593_p0 = scmp.lt.s32.totalorder %s5584_s29, %s5584_s29 }
  0x9c   : > { %p5587_p11 = pnand %p5585_p10, %p5848_p8  ;;  %p5594_p2 = por %p5593_p0, %p5592_p13 }
  0x9e   : > { %p5588_p12 = pneg %p5587_p11 }
  0xa0   : > { %p5595_p5 = pnand %p5594_p2, %p5588_p12 }
  0xa2   : > { %5598 = shalt.err (!%p5595_p5)
}
  0xa3   : > { %4930 = dma.hbm_to_vmem [thread:$0]  (!%p5834_p6), %s6366_s11, 16384, %s430_s3, [#allocation12], %s5718_s13, %s5718_s13, %s5719_s21  }
  0xa4   : > { %s4422_s16 = sadd.s32 4294967294, %s5707_s28   ;;  %s5966_s18 = sadd.s32 1, %s5707_s28  }
  0xa5   : > { %s36_s30 = ssub.s32 %s5707_s28, %s5966_s18  ;;  %s39_s17 = sadd.s32 1, %s5703_s27 }
  0xa6   : > { %p37_p8 = scmp.eq.s32.totalorder %s36_s30, 0  ;;  %p46_p7 = scmp.ne.s32.totalorder %s5703_s27, %s5699_s26 }
  0xa7   : > { %p47_p9 = scmp.eq.s32.totalorder %s5707_s28, 0  ;;  %p52_p4 = scmp.ne.s32.totalorder %s5699_s26, %s5695_s25 }
  0xa8   : > { %s5977_s20 = scalar_select %p37_p8, %s5703_s27, %s39_s17  }
  0xa9   : > { %p5979_p1 = por %p47_p9, %p46_p7  ;;  %p6386_p3 = scmp.eq.s32.totalorder %s5818_s14, 0 }
  0xaa   : > { %p328_p10 = scmp.eq.s32.totalorder %s5818_s14, 1  ;;  %p334_p11 = scmp.eq.s32.totalorder %s4422_s16, 1 }
  0xab   : > { %p5985_p6 = por %p6386_p3, %p52_p4  ;;  %p4945_p12 = scmp.lt.s32.totalorder %s5707_s28, 2 }
  0xac   : > { %s446_s21 = sand.u32 1, %s5703_s27   ;;  %p5992_p13 = por %p328_p10, %p46_p7 }
  0xad   : > { %p5996_p0 = por %p334_p11, %p52_p4  ;;  %s4431_s8 = sshll.u32 %s446_s21, 4 }
  0xae   : > { %s6388_s3 = scalar_select %p5992_p13, 1, 0 }
  0xaf   : > { %s6389_s7 = scalar_select %p5996_p0, 1, 0 }
  0xb0   : > { %s4850_s1 = sshll.u32 %s5707_s28, 8  ;;  %s450_s29 = scalar_lea.vmem [#allocation2], %s4431_s8 }
  0xb1   : > { %s6004_s24 = scalar_lea.hbm %s6355_s0, %s4850_s1  ;;  %s458_s23 = sshll.u32 %s450_s29, 4  ;;  %s6006_s23 = int_to_ptr.vmem [resolvable:$true] %s458_s23 }
  0xb2   : > { %p6010_p2 = pnand %p4945_p12, %p5979_p1  ;;  %s447_s16 = scalar_lea.sflag [#allocation3], %s446_s21 }
  0xb3   : > { %s5599_s30 = scalar_lea.hbm %s6004_s24, 256  ;;  %s5604_s1 = scalar_lea.hbm %s6355_s0, 512 }
  0xb4   : > { %p5600_p5 = scmp.ne.s32.totalorder %s6004_s24, %s5599_s30  ;;  %p5601_p8 = pneg %p6010_p2 }
  0xb5   : > { %p5605_p4 = scmp.lt.u32.totalorder %s6004_s24, %s6355_s0  ;;  %p5606_p1 = scmp.lt.u32.totalorder %s5604_s1, %s5599_s30 }
  0xb6   : > { %p5602_p7 = pnand %p5601_p8, %p5600_p5  ;;  %p5608_p10 = scmp.lt.u32.totalorder %s5599_s30, %s6004_s24 }
  0xb7   : > { %p5607_p3 = por %p5606_p1, %p5605_p4 }
  0xb8   : > { %p5603_p9 = pneg %p5602_p7 }
  0xb9   : > { %p5609_p11 = por %p5608_p10, %p5607_p3 }
  0xbb   : > { %p5610_p12 = pnand %p5609_p11, %p5603_p9 }
  0xbd   : > { %5613 = shalt.err (!%p5610_p12)
}
  0xbe   : > { %s5614_s21 = scalar_lea.vmem %s6006_s23, 256  ;;  %s5721_s22 = smov [#allocation2]  }
  0xbf   : > { %p5615_p5 = scmp.ne.s32.totalorder %s6006_s23, %s5614_s21  ;;  %s5619_s29 = sshll.u32 %s5721_s22, 4  ;;  %s5620_s29 = int_to_ptr.vmem [resolvable:$false] %s5619_s29 }
  0xc0   : > { %s5621_s17 = scalar_lea.vmem %s5620_s29, 512  ;;  %p5622_p13 = scmp.lt.s32.totalorder %s6006_s23, %s5620_s29 }
  0xc1   : > { %p5617_p7 = pnand %p5615_p5, %p5601_p8  ;;  %p5623_p4 = scmp.lt.s32.totalorder %s5621_s17, %s5614_s21 }
  0xc3   : > { %p5618_p0 = pneg %p5617_p7  ;;  %p5624_p1 = por %p5623_p4, %p5622_p13 }
  0xc5   : > { %p5625_p3 = pnand %p5624_p1, %p5618_p0 }
  0xc7   : > { %5628 = shalt.err (!%p5625_p3)
}
  0xc8   : > { %4934 = dma.hbm_to_vmem [thread:$0]  (!%p6010_p2), %s6004_s24, 256, %s6006_s23, %s447_s16  }
  0xc9   : > { %p6391_p9 = scmp.ne.s32.totalorder %s6380_s15, 0 }
  0xca   : > { %s6042_s30 = sand.u32 (!%p6391_p9), 1, %s5699_s26  }
  0xcb   : > { %467 = sbr.rel (%p6391_p9) target bundleno = 2633 (0xa49), region = 72  ;;  %s4435_s8 = sshll.u32 (!%p6391_p9), %s6042_s30, 4 }
  0xcc   : > { %s470_s1 = scalar_lea.sflag (!%p6391_p9), [#allocation3], %s6042_s30  ;;  %s6048_s12 = scalar_lea.vmem (!%p6391_p9), [#allocation2], %s4435_s8 }
  0xd2   : > { %5674 = dma.done.wait (%p5985_p6), %s470_s1, 256  }
  0xd3   : > { %5676 = vsyncadd (%p5985_p6), %s470_s1, 4294967040  ;;  %p6392_p13 = scmp.eq.s32.totalorder %s5818_s14, 0 }
  0xd5   : > { %5678 = dma.done.wait (%p6392_p13), [#allocation6], 64   ;;  %p6393_p0 = pmov %p6392_p13 }
  0xd7   : > { %5680 = vsyncadd (%p6393_p0), [#allocation6], 4294967232  ;;  %p6394_p2 = pmov %p6393_p0 }
  0xd8   : > { %p6395_p8 = pmov %p6393_p0 }
  0xd9   : > { %5682 = dma.done.wait (%p6394_p2), [#allocation9], 16384  }
  0xda   : > { %5684 = vsyncadd (%p6395_p8), [#allocation9], 4294950912  ;;  %p6396_p10 = pmov %p6393_p0 }
  0xdb   : > { %p6397_p11 = pmov %p6393_p0 }
  0xdc   : > { %5686 = dma.done.wait (%p6396_p10), [#allocation12], 32768  }
  0xdd   : > { %5688 = vsyncadd (%p6397_p11), [#allocation12], 4294934528  ;;  %v6067_v0 = vld [vmem:[%s6048_s12] sm:$0xff]  ;;  %v6070_v1 = vld [vmem:[%s6048_s12 + $0x8] sm:$0xff]  ;;  %vm5723_vm0 = vmmov 0   ;;  %vm1785_vm1 = vcmask 1043456  }
  0xde   : > { %v545_v2 = vadd.f32 %v6070_v1, %v6067_v0  ;;  %v5001_v3 = vld [vmem:[#allocation8 + $0x4] ss:$24 sps:$4 sm:$0xff]   ;;  %v5003_v4 = vld [vmem:[#allocation8] ss:$24 sps:$4 sm:$0xff]   ;;  %v5007_v7 = vld [vmem:[#allocation8 + $0x34] ss:$24 sps:$4 sm:$0xff]  }
  0xdf   : > { %v5004_v5 = vld [vmem:[#allocation8 + $0xc] ss:$24 sps:$4 sm:$0xff]   ;;  %v5006_v6 = vld [vmem:[#allocation8 + $0x8] ss:$24 sps:$4 sm:$0xff]   ;;  %1198 = vmatprep.subr.bf16.mxu0 %v5001_v3  ;;  %v5010_v8 = vld [vmem:[#allocation8 + $0x3c] ss:$24 sps:$4 sm:$0xff]  }
  0xe0   : > { %546 = vadd.xlane.f32.xlu0 %v545_v2  ;;  %1239 = vmatprep.subr.bf16.mxu1 %v5004_v5  ;;  %v5009_v9 = vld [vmem:[#allocation8 + $0x30] ss:$24 sps:$4 sm:$0xff]   ;;  %v5013_v11 = vld [vmem:[#allocation8 + $0x64] ss:$24 sps:$4 sm:$0xff]   ;;  %v5015_v13 = vld [vmem:[#allocation8 + $0x60] ss:$24 sps:$4 sm:$0xff]  }
  0xe1   : > { %1199 = vmatpush1.bf16.msra.mxu0 %v5003_v4  ;;  %1240 = vmatpush1.bf16.msra.mxu1 %v5006_v6  ;;  %v5012_v10 = vld [vmem:[#allocation8 + $0x38] ss:$24 sps:$4 sm:$0xff]   ;;  %v5016_v12 = vld [vmem:[#allocation8 + $0x6c] ss:$24 sps:$4 sm:$0xff]   ;;  %v5018_v14 = vld [vmem:[#allocation8 + $0x68] ss:$24 sps:$4 sm:$0xff]  }
  0xe2   : > { %1200 = vmatprep.subr.bf16.mxu0 %v5007_v7  ;;  %1241 = vmatprep.subr.bf16.mxu1 %v5010_v8  ;;  %v5019_v15 = vld [vmem:[#allocation8 + $0x94] ss:$24 sps:$4 sm:$0xff]   ;;  %v5021_v17 = vld [vmem:[#allocation8 + $0x90] ss:$24 sps:$4 sm:$0xff]   ;;  %v5025_v19 = vld [vmem:[#allocation8 + $0xc4] ss:$24 sps:$4 sm:$0xff]  }
  0xe3   : > { %v5022_v16 = vld [vmem:[#allocation8 + $0x9c] ss:$24 sps:$4 sm:$0xff]   ;;  %v5024_v18 = vld [vmem:[#allocation8 + $0x98] ss:$24 sps:$4 sm:$0xff]   ;;  %v5028_v20 = vld [vmem:[#allocation8 + $0xcc] ss:$24 sps:$4 sm:$0xff]  }
  0xe4   : > { %v5027_v21 = vld [vmem:[#allocation8 + $0xc0] ss:$24 sps:$4 sm:$0xff]   ;;  %v5031_v23 = vld [vmem:[#allocation8 + $0xf4] ss:$24 sps:$4 sm:$0xff]   ;;  %v5033_v25 = vld [vmem:[#allocation8 + $0xf0] ss:$24 sps:$4 sm:$0xff]  }
  0xe5   : > { %1201 = vmatpush1.bf16.msra.mxu0 %v5009_v9  ;;  %1242 = vmatpush1.bf16.msra.mxu1 %v5012_v10  ;;  %v5030_v22 = vld [vmem:[#allocation8 + $0xc8] ss:$24 sps:$4 sm:$0xff]   ;;  %v5034_v24 = vld [vmem:[#allocation8 + $0xfc] ss:$24 sps:$4 sm:$0xff]   ;;  %v5036_v26 = vld [vmem:[#allocation8 + $0xf8] ss:$24 sps:$4 sm:$0xff]  }
  0xe6   : > { %1202 = vmatprep.subr.bf16.mxu0 %v5013_v11  ;;  %1243 = vmatprep.subr.bf16.mxu1 %v5016_v12  ;;  %v5037_v27 = vld [vmem:[#allocation8 + $0x124] ss:$24 sps:$4 sm:$0xff]   ;;  %v5039_v29 = vld [vmem:[#allocation8 + $0x120] ss:$24 sps:$4 sm:$0xff]   ;;  %v5043_v31 = vld [vmem:[#allocation8 + $0x154] ss:$24 sps:$4 sm:$0xff]  }
  0xe7   : > { %v5040_v28 = vld [vmem:[#allocation8 + $0x12c] ss:$24 sps:$4 sm:$0xff]   ;;  %v5042_v30 = vld [vmem:[#allocation8 + $0x128] ss:$24 sps:$4 sm:$0xff]   ;;  %v5046_v32 = vld [vmem:[#allocation8 + $0x15c] ss:$24 sps:$4 sm:$0xff]  }
  0xe8   : > { %v5045_v33 = vld [vmem:[#allocation8 + $0x150] ss:$24 sps:$4 sm:$0xff]   ;;  %v5049_v35 = vld [vmem:[#allocation8 + $0x184] ss:$24 sps:$4 sm:$0xff]   ;;  %v5051_v37 = vld [vmem:[#allocation8 + $0x180] ss:$24 sps:$4 sm:$0xff]  }
  0xe9   : > { %1203 = vmatpush1.bf16.msra.mxu0 %v5015_v13  ;;  %1244 = vmatpush1.bf16.msra.mxu1 %v5018_v14  ;;  %v5048_v34 = vld [vmem:[#allocation8 + $0x158] ss:$24 sps:$4 sm:$0xff]   ;;  %v5052_v36 = vld [vmem:[#allocation8 + $0x18c] ss:$24 sps:$4 sm:$0xff]   ;;  %v5054_v38 = vld [vmem:[#allocation8 + $0x188] ss:$24 sps:$4 sm:$0xff]   ;;  %v563_v13 = vlaneseq }
  0xea   : > { %1204 = vmatprep.subr.bf16.mxu0 %v5019_v15  ;;  %1245 = vmatprep.subr.bf16.mxu1 %v5022_v16  ;;  %v5055_v39 = vld [vmem:[#allocation8 + $0x1b4] ss:$24 sps:$4 sm:$0xff]   ;;  %v5057_v41 = vld [vmem:[#allocation8 + $0x1b0] ss:$24 sps:$4 sm:$0xff]   ;;  %v5061_v43 = vld [vmem:[#allocation8 + $0x1e4] ss:$24 sps:$4 sm:$0xff]  }
  0xeb   : > { %v5058_v40 = vld [vmem:[#allocation8 + $0x1bc] ss:$24 sps:$4 sm:$0xff]   ;;  %v5060_v42 = vld [vmem:[#allocation8 + $0x1b8] ss:$24 sps:$4 sm:$0xff]   ;;  %v5064_v52 = vld [vmem:[#allocation8 + $0x1ec] ss:$24 sps:$4 sm:$0xff]  }
  0xec   : > { %v5063_v51 = vld [vmem:[#allocation8 + $0x1e0] ss:$24 sps:$4 sm:$0xff]   ;;  %v5067_v54 = vld [vmem:[#allocation8 + $0x214] ss:$24 sps:$4 sm:$0xff]   ;;  %v5069_v55 = vld [vmem:[#allocation8 + $0x210] ss:$24 sps:$4 sm:$0xff]  }
  0xed   : > { %1205 = vmatpush1.bf16.msra.mxu0 %v5021_v17  ;;  %1246 = vmatpush1.bf16.msra.mxu1 %v5024_v18  ;;  %v5066_v53 = vld [vmem:[#allocation8 + $0x1e8] ss:$24 sps:$4 sm:$0xff]   ;;  %v5070_v56 = vld [vmem:[#allocation8 + $0x21c] ss:$24 sps:$4 sm:$0xff]   ;;  %v5072_v57 = vld [vmem:[#allocation8 + $0x218] ss:$24 sps:$4 sm:$0xff]  }
  0xee   : > { %1206 = vmatprep.subr.bf16.mxu0 %v5025_v19  ;;  %1247 = vmatprep.subr.bf16.mxu1 %v5028_v20  ;;  %v5073_v58 = vld [vmem:[#allocation8 + $0x244] ss:$24 sps:$4 sm:$0xff]   ;;  %v5075_v59 = vld [vmem:[#allocation8 + $0x240] ss:$24 sps:$4 sm:$0xff]   ;;  %v5079_v62 = vld [vmem:[#allocation8 + $0x274] ss:$24 sps:$4 sm:$0xff]  }
  0xef   : > { %v5076_v60 = vld [vmem:[#allocation8 + $0x24c] ss:$24 sps:$4 sm:$0xff]   ;;  %v5078_v61 = vld [vmem:[#allocation8 + $0x248] ss:$24 sps:$4 sm:$0xff]   ;;  %v5082_v63 = vld [vmem:[#allocation8 + $0x27c] ss:$24 sps:$4 sm:$0xff]  }
  0xf0   : > { %v5085_v2 = vld [vmem:[#allocation8 + $0x2a4] ss:$24 sps:$4 sm:$0xff]   ;;  %v5087_v4 = vld [vmem:[#allocation8 + $0x2a0] ss:$24 sps:$4 sm:$0xff]   ;;  %v5091_v6 = vld [vmem:[#allocation8 + $0x2d4] ss:$24 sps:$4 sm:$0xff]  }
  0xf1   : > { %1207 = vmatpush1.bf16.msra.mxu0 %v5027_v21  ;;  %1248 = vmatpush1.bf16.msra.mxu1 %v5030_v22  ;;  %v5088_v3 = vld [vmem:[#allocation8 + $0x2ac] ss:$24 sps:$4 sm:$0xff]   ;;  %v5090_v5 = vld [vmem:[#allocation8 + $0x2a8] ss:$24 sps:$4 sm:$0xff]   ;;  %v5094_v7 = vld [vmem:[#allocation8 + $0x2dc] ss:$24 sps:$4 sm:$0xff]  }
  0xf2   : > { %1208 = vmatprep.subr.bf16.mxu0 %v5031_v23  ;;  %1249 = vmatprep.subr.bf16.mxu1 %v5034_v24  ;;  %v5093_v8 = vld [vmem:[#allocation8 + $0x2d0] ss:$24 sps:$4 sm:$0xff]   ;;  %v5099_v10 = vld [vmem:[#allocation8 + $0x14] ss:$24 sps:$4 sm:$0xff]   ;;  %v6084_v15 = vshrl.u32 %v563_v13, 7  ;;  %vm1757_vm2 = vcmask 64512  }
  0xf3   : > { %v5096_v9 = vld [vmem:[#allocation8 + $0x2d8] ss:$24 sps:$4 sm:$0xff]   ;;  %v543_v18 = vld [vmem:[#allocation5] sm:$0x3]  ;;  %v544_v19 = vld [vmem:[#allocation7] sm:$0x3] }
  0xf4   : > { %v6087_v16 = vsub.s32 1, %v6084_v15  ;;  %v6090_v17 = vsub.s32 0, %v6084_v15  ;;  %s6398_s10 = sld [smem:[#allocation22_spill]]  ;;  %s6399_s29 = sld [smem:[#allocation23_spill]] }
  0xf5   : > { %1209 = vmatpush1.bf16.msra.mxu0 %v5033_v25  ;;  %1250 = vmatpush1.bf16.msra.mxu1 %v5036_v26  ;;  %s6401_s24 = sld [smem:[#allocation25_spill]]  ;;  %s4851_s23 = sshll.u32 %s5818_s14, 8 }
  0xf6   : > { %1210 = vmatprep.subr.bf16.mxu0 %v5037_v27  ;;  %1251 = vmatprep.subr.bf16.mxu1 %v5040_v28  ;;  %v570_v20 = vrot.slane %v543_v18, %v6087_v16  ;;  %v566_v21 = vrot.slane %v543_v18, %v6090_v17  ;;  %v583_v24 = vrot.slane %v544_v19, %v6087_v16  ;;  %s539_s19 = scalar_lea.vmem [#allocation14], %s4435_s8  ;;  %s6402_s22 = sld [smem:[#allocation26_spill]] }
  0xf7   : > { %v579_v26 = vrot.slane %v544_v19, %v6090_v17  ;;  %s4295_s16 = sshll.u32 %s539_s19, 4  ;;  %s4281_s14 = scalar_lea.sflag [#allocation4], %s6042_s30  ;;  %s6313_s16 = int_to_ptr.vmem [resolvable:$true] %s4295_s16 }
  0xf8   : > { %s5629_s8 = scalar_lea.vmem %s6313_s16, 256  ;;  %p6403_p12 = scmp.ne.s32.totalorder %s6388_s3, 0 }
  0xf9   : > { %1211 = vmatpush1.bf16.msra.mxu0 %v5039_v29  ;;  %1252 = vmatpush1.bf16.msra.mxu1 %v5042_v30  ;;  %p5630_p6 = scmp.ne.s32.totalorder %s6313_s16, %s5629_s8  ;;  %s5726_s17 = smov [#allocation14]  }
  0xfa   : > { %1212 = vmatprep.subr.bf16.mxu0 %v5043_v31  ;;  %1253 = vmatprep.subr.bf16.mxu1 %v5046_v32  ;;  %v5097_v32 = vld [vmem:[#allocation8 + $0x10] ss:$24 sps:$4 sm:$0xff]   ;;  %s5633_s1 = sshll.u32 %s5726_s17, 4  ;;  %s5634_s1 = int_to_ptr.vmem [resolvable:$false] %s5633_s1 }
  0xfb   : > { %p5631_p5 = pnand %p5630_p6, %p6403_p12  ;;  %p5636_p4 = scmp.lt.s32.totalorder %s6313_s16, %s5634_s1 }
  0xfd   : > { %1213 = vmatpush1.bf16.msra.mxu0 %v5045_v33  ;;  %1254 = vmatpush1.bf16.msra.mxu1 %v5048_v34  ;;  %v5102_v34 = vld [vmem:[#allocation8 + $0x44] ss:$24 sps:$4 sm:$0xff]   ;;  %p5632_p7 = pneg %p5631_p5 }
  0xfe   : > { %1214 = vmatprep.subr.bf16.mxu0 %v5049_v35  ;;  %1255 = vmatprep.subr.bf16.mxu1 %v5052_v36  ;;  %v5100_v35 = vld [vmem:[#allocation8 + $0x40] ss:$24 sps:$4 sm:$0xff]   ;;  %v5105_v36 = vld [vmem:[#allocation8 + $0x74] ss:$24 sps:$4 sm:$0xff]  }
 0x101   : > { %1215 = vmatpush1.bf16.msra.mxu0 %v5051_v37  ;;  %1256 = vmatpush1.bf16.msra.mxu1 %v5054_v38  ;;  %v5103_v37 = vld [vmem:[#allocation8 + $0x70] ss:$24 sps:$4 sm:$0xff]   ;;  %v5108_v38 = vld [vmem:[#allocation8 + $0xa4] ss:$24 sps:$4 sm:$0xff]  }
 0x102   : > { %1216 = vmatprep.subr.bf16.mxu0 %v5055_v39  ;;  %1257 = vmatprep.subr.bf16.mxu1 %v5058_v40  ;;  %v5106_v39 = vld [vmem:[#allocation8 + $0xa0] ss:$24 sps:$4 sm:$0xff]   ;;  %v5111_v40 = vld [vmem:[#allocation8 + $0xd4] ss:$24 sps:$4 sm:$0xff]  }
 0x105   : > { %1217 = vmatpush1.bf16.msra.mxu0 %v5057_v41  ;;  %1258 = vmatpush1.bf16.msra.mxu1 %v5060_v42  ;;  %v5109_v41 = vld [vmem:[#allocation8 + $0xd0] ss:$24 sps:$4 sm:$0xff]   ;;  %v5114_v42 = vld [vmem:[#allocation8 + $0x104] ss:$24 sps:$4 sm:$0xff]  }
 0x106   : > { %1218 = vmatprep.subr.bf16.mxu0 %v5061_v43  ;;  %1259 = vmatprep.subr.bf16.mxu1 %v5064_v52  ;;  %v5112_v43 = vld [vmem:[#allocation8 + $0x100] ss:$24 sps:$4 sm:$0xff]   ;;  %v5129_v52 = vld [vmem:[#allocation8 + $0x1f4] ss:$24 sps:$4 sm:$0xff]  }
 0x109   : > { %1219 = vmatpush1.bf16.msra.mxu0 %v5063_v51  ;;  %1260 = vmatpush1.bf16.msra.mxu1 %v5066_v53  ;;  %v5124_v51 = vld [vmem:[#allocation8 + $0x1c0] ss:$24 sps:$4 sm:$0xff]   ;;  %v5127_v53 = vld [vmem:[#allocation8 + $0x1f0] ss:$24 sps:$4 sm:$0xff]  }
 0x10a   : > { %1220 = vmatprep.subr.bf16.mxu0 %v5067_v54  ;;  %1261 = vmatprep.subr.bf16.mxu1 %v5070_v56  ;;  %v5132_v54 = vld [vmem:[#allocation8 + $0x224] ss:$24 sps:$4 sm:$0xff]   ;;  %v5135_v56 = vld [vmem:[#allocation8 + $0x254] ss:$24 sps:$4 sm:$0xff]  }
 0x10d   : > { %1221 = vmatpush1.bf16.msra.mxu0 %v5069_v55  ;;  %1262 = vmatpush1.bf16.msra.mxu1 %v5072_v57  ;;  %v5130_v55 = vld [vmem:[#allocation8 + $0x220] ss:$24 sps:$4 sm:$0xff]   ;;  %v5133_v57 = vld [vmem:[#allocation8 + $0x250] ss:$24 sps:$4 sm:$0xff]  }
 0x10e   : > { %1222 = vmatprep.subr.bf16.mxu0 %v5073_v58  ;;  %1263 = vmatprep.subr.bf16.mxu1 %v5076_v60  ;;  %v5138_v58 = vld [vmem:[#allocation8 + $0x284] ss:$24 sps:$4 sm:$0xff]   ;;  %v5141_v60 = vld [vmem:[#allocation8 + $0x2b4] ss:$24 sps:$4 sm:$0xff]  }
 0x111   : > { %1223 = vmatpush1.bf16.msra.mxu0 %v5075_v59  ;;  %1264 = vmatpush1.bf16.msra.mxu1 %v5078_v61  ;;  %v5136_v59 = vld [vmem:[#allocation8 + $0x280] ss:$24 sps:$4 sm:$0xff]   ;;  %v5139_v61 = vld [vmem:[#allocation8 + $0x2b0] ss:$24 sps:$4 sm:$0xff]  }
 0x112   : > { %1224 = vmatprep.subr.bf16.mxu0 %v5079_v62  ;;  %1265 = vmatprep.subr.bf16.mxu1 %v5082_v63  ;;  %v5144_v62 = vld [vmem:[#allocation8 + $0x2e4] ss:$24 sps:$4 sm:$0xff]   ;;  %v5142_v63 = vld [vmem:[#allocation8 + $0x2e0] ss:$24 sps:$4 sm:$0xff]  }
 0x16d   : > { %v547_v44 = vpop.xlane.xlu0 %546 }
 0x16e   : > { %v549_v45 = vmul.f32 0.00390625, %v547_v44  ;;  %v5117_v44 = vld [vmem:[#allocation8 + $0x134] ss:$24 sps:$4 sm:$0xff]  }
 0x170   : > { %v6075_v46 = vsub.f32 %v6067_v0, %v549_v45  ;;  %v6078_v47 = vsub.f32 %v6070_v1, %v549_v45  ;;  %v5081_v0 = vld [vmem:[#allocation8 + $0x270] ss:$24 sps:$4 sm:$0xff]  }
 0x171   : > { %v5084_v1 = vld [vmem:[#allocation8 + $0x278] ss:$24 sps:$4 sm:$0xff]   ;;  %1225 = vmatpush1.bf16.msra.mxu0 %v5081_v0  ;;  %v5722_v0 = vmov 0.0  }
 0x172   : > { %v552_v48 = vmul.f32 %v6075_v46, %v6075_v46  ;;  %v553_v49 = vmul.f32 %v6078_v47, %v6078_v47  ;;  %1266 = vmatpush1.bf16.msra.mxu1 %v5084_v1  ;;  %1226 = vmatprep.subr.bf16.mxu0 %v5085_v2  ;;  %v5115_v45 = vld [vmem:[#allocation8 + $0x130] ss:$24 sps:$4 sm:$0xff]   ;;  %v5724_v1 = vmov 1983009808  }
 0x173   : > { %1267 = vmatprep.subr.bf16.mxu1 %v5088_v3  ;;  %v1325_v2 = vunpack.c.l.s4 %v5724_v1  ;;  %v698_v3 = vsub.s32 2, %v6084_v15 }
 0x174   : > { %v554_v50 = vadd.f32 %v553_v49, %v552_v48  ;;  %v5123_v48 = vld [vmem:[#allocation8 + $0x194] ss:$24 sps:$4 sm:$0xff]   ;;  %v5121_v49 = vld [vmem:[#allocation8 + $0x190] ss:$24 sps:$4 sm:$0xff]  }
 0x175   : > { %1227 = vmatpush1.bf16.msra.mxu0 %v5087_v4  ;;  %v6113_v4 = vld [vmem:[%s6359_s4] sm:$0x3f] }
 0x176   : > { %555 = vadd.xlane.f32.xlu0 %v554_v50  ;;  %1268 = vmatpush1.bf16.msra.mxu1 %v5090_v5  ;;  %v5126_v50 = vld [vmem:[#allocation8 + $0x1c4] ss:$24 sps:$4 sm:$0xff]   ;;  %v702_v5 = vsub.s32 3, %v6084_v15 }
 0x177   : > { %1228 = vmatprep.subr.bf16.mxu0 %v5091_v6  ;;  %1269 = vmatprep.subr.bf16.mxu1 %v5094_v7  ;;  %v1326_v6 = vunpack.c.0.s8 %v1325_v2  ;;  %v5725_v7 = vmov 1934713408  }
 0x179   : > { %1229 = vmatpush1.bf16.msra.mxu0 %v5093_v8  ;;  %v1356_v8 = vunpack.c.l.s4 %v5725_v7  ;;  %v6127_v13 = vsub.s32 %v1326_v6, %v6084_v15 }
 0x17a   : > { %1270 = vmatpush1.bf16.msra.mxu1 %v5096_v9  ;;  %1280 = vmatprep.subr.bf16.mxu0 %v5099_v10  ;;  %v691_v9 = vrot.slane %v6113_v4, %v6090_v17  ;;  %v699_v10 = vrot.slane %v6113_v4, %v698_v3 }
 0x17b   : > { %4872 = vmatprep.subr.bf16.mxu1 %v5722_v0 }
 0x203   : > { %v556_v11 = vpop.xlane.xlu0 %555 }
 0x204   : > { %v557_v12 = vmul.f32 0.00390625, %v556_v11  ;;  %v695_v11 = vrot.slane %v6113_v4, %v6087_v16 }
 0x206   : > { %v558_v14 = vadd.f32 1e-05, %v557_v12  ;;  %v703_v12 = vrot.slane %v6113_v4, %v702_v5 }
 0x208   : > { %5385 = vrsqrt.f32 %v558_v14  ;;  %v1357_v14 = vunpack.c.0.s8 %v1356_v8 }
 0x212   : > { %v5386_v22 = vpop.eup %5385 }
 0x213   : > { %v561_v23 = vmul.f32 %v5386_v22, %v6078_v47  ;;  %v560_v25 = vmul.f32 %v5386_v22, %v6075_v46  ;;  %v5120_v46 = vld [vmem:[#allocation8 + $0x164] ss:$24 sps:$4 sm:$0xff]   ;;  %v5118_v47 = vld [vmem:[#allocation8 + $0x160] ss:$24 sps:$4 sm:$0xff]  }
 0x215   : > { %v574_v27 = vmul.f32 %v570_v20, %v561_v23  ;;  %v573_v28 = vmul.f32 %v566_v21, %v560_v25 }
 0x217   : > { %v587_v29 = vadd.f32 %v583_v24, %v574_v27  ;;  %v586_v30 = vadd.f32 %v579_v26, %v573_v28 }
 0x219   : > { %v589_v31 = vpack.c.bf16 %v587_v29, %v587_v29  ;;  %v6098_v33 = vpack.c.bf16 %v586_v30, %v586_v30 }
 0x21b   : > { %1230 = vmatprep.mubr.bf16.mxu0 %v589_v31  ;;  %1271 = vmatprep.mubr.bf16.mxu1 %v589_v31 }
 0x21c   : > { %1231 = vmatmul.mubr.bf16.vlgmr.msra.gmra.mrb[0].mxu0 %v6098_v33  ;;  %1272 = vmatmul.mubr.bf16.vlgmr.msra.gmra.mrb[0].mxu1 %v6098_v33 }
 0x21d   : > { %1281 = vmatpush1.bf16.msra.mxu0 %v5097_v32  ;;  %1312 = vmatprep.mubr.bf16.mxu0 %v589_v31 }
 0x21e   : > { %1282 = vmatprep.subr.bf16.mxu0 %v5102_v34  ;;  %4874 = vmatprep.mubr.msk.bf16.mxu1 %vm5723_vm0, %v5722_v0 }
 0x221   : > { %1283 = vmatpush1.bf16.msra.mxu0 %v5100_v35 }
 0x222   : > { %1284 = vmatprep.subr.bf16.mxu0 %v5105_v36 }
 0x225   : > { %1285 = vmatpush1.bf16.msra.mxu0 %v5103_v37 }
 0x226   : > { %1286 = vmatprep.subr.bf16.mxu0 %v5108_v38 }
 0x229   : > { %1287 = vmatpush1.bf16.msra.mxu0 %v5106_v39 }
 0x22a   : > { %1288 = vmatprep.subr.bf16.mxu0 %v5111_v40 }
 0x22d   : > { %1289 = vmatpush1.bf16.msra.mxu0 %v5109_v41 }
 0x22e   : > { %1290 = vmatprep.subr.bf16.mxu0 %v5114_v42 }
 0x231   : > { %1291 = vmatpush1.bf16.msra.mxu0 %v5112_v43 }
 0x232   : > { %1292 = vmatprep.subr.bf16.mxu0 %v5117_v44 }
 0x235   : > { %1293 = vmatpush1.bf16.msra.mxu0 %v5115_v45 }
 0x236   : > { %1294 = vmatprep.subr.bf16.mxu0 %v5120_v46 }
 0x239   : > { %1295 = vmatpush1.bf16.msra.mxu0 %v5118_v47 }
 0x23a   : > { %1296 = vmatprep.subr.bf16.mxu0 %v5123_v48 }
 0x23d   : > { %1297 = vmatpush1.bf16.msra.mxu0 %v5121_v49 }
 0x23e   : > { %1298 = vmatprep.subr.bf16.mxu0 %v5126_v50 }
 0x241   : > { %1299 = vmatpush1.bf16.msra.mxu0 %v5124_v51 }
 0x242   : > { %1300 = vmatprep.subr.bf16.mxu0 %v5129_v52 }
 0x245   : > { %1301 = vmatpush1.bf16.msra.mxu0 %v5127_v53 }
 0x246   : > { %1302 = vmatprep.subr.bf16.mxu0 %v5132_v54 }
 0x249   : > { %1303 = vmatpush1.bf16.msra.mxu0 %v5130_v55 }
 0x24a   : > { %1304 = vmatprep.subr.bf16.mxu0 %v5135_v56 }
 0x24d   : > { %1305 = vmatpush1.bf16.msra.mxu0 %v5133_v57 }
 0x24e   : > { %1306 = vmatprep.subr.bf16.mxu0 %v5138_v58 }
 0x251   : > { %1307 = vmatpush1.bf16.msra.mxu0 %v5136_v59 }
 0x252   : > { %1308 = vmatprep.subr.bf16.mxu0 %v5141_v60 }
 0x255   : > { %1309 = vmatpush1.bf16.msra.mxu0 %v5139_v61 }
 0x256   : > { %1310 = vmatprep.subr.bf16.mxu0 %v5144_v62 }
 0x259   : > { %1311 = vmatpush1.bf16.msra.mxu0 %v5142_v63 }
 0x25a   : > { %4860 = vmatprep.subr.bf16.mxu0 %v5722_v0 }
 0x25c   : > { %1313 = vmatmul.mubr.bf16.vlgmr.msra.gmra.mrb[4].mxu0 %v6098_v33  ;;  %v6132_v33 = vsub.s32 %v1357_v14, %v6084_v15 }
 0x25d   : > { %4862 = vmatprep.mubr.msk.bf16.mxu0 %vm5723_vm0, %v5722_v0 }
 0x2ef   : > { %v1232_v18 = vpop.f32.mrb[0].mxu0  ;;  %v1273_v19 = vpop.f32.mrb[0].mxu1 }
 0x2f0   : > { %v1233_v20 = vadd.f32 %v1232_v18, %v691_v9  ;;  %v1274_v21 = vadd.f32 %v1273_v19, %v699_v10  ;;  %v1234_v22 = vpop.f32.mrb[1].mxu0  ;;  %v1275_v23 = vpop.f32.mrb[1].mxu1 }
 0x2f1   : > { %v1235_v24 = vadd.f32 %v1234_v22, %v695_v11  ;;  %v1276_v25 = vadd.f32 %v1275_v23, %v703_v12  ;;  %v1236_v26 = vpop.f32.mrb[2].mxu0  ;;  %v1277_v27 = vpop.f32.mrb[2].mxu1 }
 0x2f2   : > { %v1321_v28 = vmul.f32 0.088388346, %v1233_v20  ;;  %v1441_v29 = vcombine.high %v1274_v21, %v5722_v0  ;;  %v1448_v30 = vrot.slane %v1274_v21, %v6127_v13  ;;  %v1237_v31 = vpop.f32.mrb[3].mxu0  ;;  %v1278_v32 = vpop.f32.mrb[3].mxu1 }
 0x2f3   : > { %v1322_v34 = vmul.f32 0.088388346, %v1235_v24  ;;  %v1456_v35 = vcombine.high %v1276_v25, %v5722_v0  ;;  %v1463_v36 = vrot.slane %v1276_v25, %v6127_v13 }
 0x2f4   : > { %v1323_v37 = vcombine.high %v1321_v28, %v5722_v0  ;;  %v1330_v38 = vrot.slane %v1321_v28, %v6127_v13  ;;  %v1455_v39 = vrot.slane %v1441_v29, %v6127_v13 }
 0x2f5   : > { %v1338_v40 = vcombine.high %v1322_v34, %v5722_v0  ;;  %v1345_v41 = vrot.slane %v1322_v34, %v6127_v13  ;;  %v1470_v42 = vrot.slane %v1456_v35, %v6127_v13  ;;  %v1471_v43 = vcombine.low %v1448_v30, %v1463_v36 }
 0x2f6   : > { %v1337_v44 = vrot.slane %v1323_v37, %v6127_v13  ;;  %v1472_v45 = vcombine.high %v1448_v30, %v1463_v36 }
 0x2f7   : > { %v1352_v46 = vrot.slane %v1338_v40, %v6127_v13  ;;  %v1353_v47 = vcombine.low %v1330_v38, %v1345_v41  ;;  %v1354_v48 = vcombine.high %v1330_v38, %v1345_v41  ;;  %v1479_v49 = vrot.slane %v1471_v43, %v6132_v33 }
 0x2f8   : > { %v1486_v50 = vrot.slane %v1472_v45, %v6132_v33  ;;  %v1487_v51 = vcombine.low %v1455_v39, %v1470_v42  ;;  %v1488_v52 = vcombine.high %v1455_v39, %v1470_v42  ;;  %v706_v38 = vsub.s32 4, %v6084_v15 }
 0x2f9   : > { %v1361_v53 = vrot.slane %v1353_v47, %v6132_v33  ;;  %v1368_v54 = vrot.slane %v1354_v48, %v6132_v33  ;;  %v1369_v55 = vcombine.low %v1337_v44, %v1352_v46  ;;  %v1370_v56 = vcombine.high %v1337_v44, %v1352_v46 }
 0x2fa   : > { %v1495_v57 = vrot.slane %v1487_v51, %v6132_v33  ;;  %v1502_v58 = vrot.slane %v1488_v52, %v6132_v33  ;;  %v1507_v59 = vcombine.low %v1479_v49, %v1486_v50  ;;  %v4541_v60 = vcombine.high %v1479_v49, %v1486_v50 }
 0x2fb   : > { %v1377_v61 = vrot.slane %v1369_v55, %v6132_v33  ;;  %v1384_v62 = vrot.slane %v1370_v56, %v6132_v33  ;;  %v1389_v63 = vcombine.low %v1361_v53, %v1368_v54  ;;  %v4539_v1 = vcombine.high %v1361_v53, %v1368_v54 }
 0x2fc   : > { %v1514_v2 = vrot.slane %v1507_v59, %v6127_v13  ;;  %v1522_v6 = vrot.slane %v4541_v60, %v6127_v13  ;;  %v1523_v7 = vcombine.low %v1495_v57, %v1502_v58  ;;  %v4542_v8 = vcombine.high %v1495_v57, %v1502_v58 }
 0x2fd   : > { %v1396_v9 = vrot.slane %v1389_v63, %v6127_v13  ;;  %v1404_v10 = vrot.slane %v4539_v1, %v6127_v13  ;;  %v1405_v11 = vcombine.low %v1377_v61, %v1384_v62  ;;  %v4540_v12 = vcombine.high %v1377_v61, %v1384_v62 }
 0x2fe   : > { %v1530_v14 = vrot.slane %v1523_v7, %v6127_v13  ;;  %v1538_v18 = vrot.slane %v4542_v8, %v6127_v13  ;;  %v1539_v19 = vcombine.low %v1514_v2, %v1522_v6  ;;  %v710_v39 = vsub.s32 5, %v6084_v15 }
 0x2ff   : > { %v1412_v20 = vrot.slane %v1405_v11, %v6127_v13  ;;  %v1420_v21 = vrot.slane %v4540_v12, %v6127_v13  ;;  %v1421_v22 = vcombine.low %v1396_v9, %v1404_v10  ;;  %v707_v40 = vrot.slane %v6113_v4, %v706_v38 }
 0x300   : > { %v1547_v23 = vcombine.low %v1530_v14, %v1538_v18  ;;  %v1546_v25 = vrot.slane %v1539_v19, %v6132_v33  ;;  %v711_v41 = vrot.slane %v6113_v4, %v710_v39 }
 0x301   : > { %v1429_v24 = vcombine.low %v1412_v20, %v1420_v21  ;;  %v1428_v27 = vrot.slane %v1421_v22, %v6132_v33 }
 0x302   : > { %v1554_v26 = vrot.slane %v1547_v23, %v6132_v33 }
 0x303   : > { %v1436_v28 = vrot.slane %v1429_v24, %v6132_v33 }
 0x304   : > { %v1555_v29 = vcombine.low %v1546_v25, %v1554_v26  ;;  %v1556_v30 = vcombine.high %v1546_v25, %v1554_v26 }
 0x305   : > { %v1437_v31 = vcombine.low %v1428_v27, %v1436_v28  ;;  %v1438_v32 = vcombine.high %v1428_v27, %v1436_v28 }
 0x306   : > { %v1557_v34 = vpack.c.bf16 %v1555_v29, %v1555_v29  ;;  %v1558_v36 = vpack.c.bf16 %v1556_v30, %v1556_v30 }
 0x307   : > { %v1439_v35 = vpack.c.bf16 %v1437_v31, %v1437_v31  ;;  %v1440_v37 = vpack.c.bf16 %v1438_v32, %v1438_v32 }
 0x308   : > { %4861 = vmatpush3.bf16.xpose.msra.mxu0 %v1557_v34 }
 0x309   : > { %4866 = vmatprep.subr.bf16.mxu0 %v5722_v0 }
 0x30f   : > { %4863 = vmatmul.mubr.bf16.vlgmr.msra.gmra.mrb[8].mxu0 %v1439_v35 }
 0x310   : > { %4867 = vmatpush3.bf16.xpose.msra.mxu0 %v1558_v36  ;;  %4868 = vmatprep.mubr.msk.bf16.mxu0 %vm5723_vm0, %v5722_v0 }
 0x317   : > { %4869 = vmatmul.mubr.bf16.vlgmr.msra.gmra.mrb[12].mxu0 %v1440_v37 }
 0x32f   : > { %v1314_v42 = vpop.f32.mrb[4].mxu0 }
 0x330   : > { %v1315_v43 = vadd.f32 %v1314_v42, %v707_v40  ;;  %v1316_v44 = vpop.f32.mrb[5].mxu0 }
 0x331   : > { %v1317_v45 = vadd.f32 %v1316_v44, %v711_v41  ;;  %v1318_v46 = vpop.f32.mrb[6].mxu0 }
 0x332   : > { %v1559_v47 = vcombine.high %v1315_v43, %v5722_v0  ;;  %v1566_v48 = vrot.slane %v1315_v43, %v6127_v13  ;;  %v1319_v49 = vpop.f32.mrb[7].mxu0 }
 0x333   : > { %v1574_v50 = vcombine.high %v1317_v45, %v5722_v0  ;;  %v1581_v51 = vrot.slane %v1317_v45, %v6127_v13 }
 0x334   : > { %v1573_v52 = vrot.slane %v1559_v47, %v6127_v13 }
 0x335   : > { %v1588_v53 = vrot.slane %v1574_v50, %v6127_v13  ;;  %v1589_v54 = vcombine.low %v1566_v48, %v1581_v51  ;;  %v1590_v4 = vcombine.high %v1566_v48, %v1581_v51  ;;  %v5147_v51 = vld [vmem:[#allocation10 + $0x4] ss:$8 sps:$4 sm:$0xff]  }
 0x337   : > { %v1597_v55 = vrot.slane %v1589_v54, %v6132_v33  ;;  %v1604_v56 = vrot.slane %v1590_v4, %v6132_v33  ;;  %v1605_v57 = vcombine.low %v1573_v52, %v1588_v53  ;;  %v1606_v58 = vcombine.high %v1573_v52, %v1588_v53  ;;  %v5145_v54 = vld [vmem:[#allocation10] ss:$8 sps:$4 sm:$0xff]  }
 0x339   : > { %v1613_v59 = vrot.slane %v1605_v57, %v6132_v33  ;;  %v1620_v60 = vrot.slane %v1606_v58, %v6132_v33  ;;  %v1625_v61 = vcombine.low %v1597_v55, %v1604_v56  ;;  %v4543_v62 = vcombine.high %v1597_v55, %v1604_v56  ;;  %v5150_v55 = vld [vmem:[#allocation10 + $0x14] ss:$8 sps:$4 sm:$0xff]   ;;  %v5148_v56 = vld [vmem:[#allocation10 + $0x10] ss:$8 sps:$4 sm:$0xff]   ;;  %v5153_v57 = vld [vmem:[#allocation10 + $0x24] ss:$8 sps:$4 sm:$0xff]  }
 0x33a   : > { %v5151_v58 = vld [vmem:[#allocation10 + $0x20] ss:$8 sps:$4 sm:$0xff]  }
 0x33b   : > { %v1632_v63 = vrot.slane %v1625_v61, %v6127_v13  ;;  %v1640_v1 = vrot.slane %v4543_v62, %v6127_v13  ;;  %v1641_v2 = vcombine.low %v1613_v59, %v1620_v60  ;;  %v4544_v6 = vcombine.high %v1613_v59, %v1620_v60  ;;  %v5156_v59 = vld [vmem:[#allocation10 + $0x34] ss:$8 sps:$4 sm:$0xff]   ;;  %v5154_v60 = vld [vmem:[#allocation10 + $0x30] ss:$8 sps:$4 sm:$0xff]   ;;  %v5159_v61 = vld [vmem:[#allocation10 + $0x44] ss:$8 sps:$4 sm:$0xff]  }
 0x33c   : > { %v5157_v62 = vld [vmem:[#allocation10 + $0x40] ss:$8 sps:$4 sm:$0xff]  }
 0x33d   : > { %v1648_v7 = vrot.slane %v1641_v2, %v6127_v13  ;;  %v1656_v8 = vrot.slane %v4544_v6, %v6127_v13  ;;  %v1657_v9 = vcombine.low %v1632_v63, %v1640_v1  ;;  %v5162_v63 = vld [vmem:[#allocation10 + $0x54] ss:$8 sps:$4 sm:$0xff]   ;;  %v5160_v1 = vld [vmem:[#allocation10 + $0x50] ss:$8 sps:$4 sm:$0xff]   ;;  %v5165_v2 = vld [vmem:[#allocation10 + $0x64] ss:$8 sps:$4 sm:$0xff]  }
 0x33e   : > { %v5163_v6 = vld [vmem:[#allocation10 + $0x60] ss:$8 sps:$4 sm:$0xff]  }
 0x33f   : > { %v1665_v10 = vcombine.low %v1648_v7, %v1656_v8  ;;  %v1664_v11 = vrot.slane %v1657_v9, %v6132_v33  ;;  %v5168_v7 = vld [vmem:[#allocation10 + $0x74] ss:$8 sps:$4 sm:$0xff]   ;;  %v5166_v8 = vld [vmem:[#allocation10 + $0x70] ss:$8 sps:$4 sm:$0xff]   ;;  %v5171_v9 = vld [vmem:[#allocation10 + $0x84] ss:$8 sps:$4 sm:$0xff]  }
 0x341   : > { %v1672_v12 = vrot.slane %v1665_v10, %v6132_v33  ;;  %v5169_v10 = vld [vmem:[#allocation10 + $0x80] ss:$8 sps:$4 sm:$0xff]  }
 0x343   : > { %v1673_v14 = vcombine.low %v1664_v11, %v1672_v12  ;;  %v1674_v18 = vcombine.high %v1664_v11, %v1672_v12  ;;  %v5174_v11 = vld [vmem:[#allocation10 + $0x94] ss:$8 sps:$4 sm:$0xff]   ;;  %v5172_v12 = vld [vmem:[#allocation10 + $0x90] ss:$8 sps:$4 sm:$0xff]  }
 0x345   : > { %v1675_v19 = vpack.c.bf16 %v1673_v14, %v1673_v14  ;;  %v1676_v20 = vpack.c.bf16 %v1674_v18, %v1674_v18  ;;  %v5177_v14 = vld [vmem:[#allocation10 + $0xa4] ss:$8 sps:$4 sm:$0xff]   ;;  %v5175_v18 = vld [vmem:[#allocation10 + $0xa0] ss:$8 sps:$4 sm:$0xff]  }
 0x347   : > { %v1787_v21 = vsel %vm1785_vm1, %v1675_v19, 0  ;;  %v1833_v22 = vsel %vm1785_vm1, %v1676_v20, 0  ;;  %v5180_v19 = vld [vmem:[#allocation10 + $0xb4] ss:$8 sps:$4 sm:$0xff]   ;;  %v5178_v20 = vld [vmem:[#allocation10 + $0xb0] ss:$8 sps:$4 sm:$0xff]  }
 0x348   : > { %4873 = vmatpush3.bf16.msra.mxu1 %v1787_v21  ;;  %v5183_v21 = vld [vmem:[#allocation10 + $0xc4] ss:$8 sps:$4 sm:$0xff]  }
 0x349   : > { %4878 = vmatprep.subr.bf16.mxu1 %v5722_v0 }
 0x3e2   : > { %v1711_v23 = vpop.f32.mrb[8].mxu0 }
 0x3e3   : > { %v4864_v24 = vpop.f32.mrb[9].mxu0  ;;  %v1758_v25 = vsel %vm1757_vm2, %v1711_v23, -inf }
 0x3e4   : > { %1759 = vmax.xlane.f32.xlu1 %v1758_v25  ;;  %v1714_v26 = vpop.f32.mrb[10].mxu0  ;;  %v5186_v24 = vld [vmem:[#allocation10 + $0xd4] ss:$8 sps:$4 sm:$0xff]   ;;  %v5189_v25 = vld [vmem:[#allocation10 + $0xe4] ss:$8 sps:$4 sm:$0xff]  }
 0x3e5   : > { %v4865_v27 = vpop.f32.mrb[11].mxu0  ;;  %v5187_v26 = vld [vmem:[#allocation10 + $0xe0] ss:$8 sps:$4 sm:$0xff]  }
 0x3e6   : > { %v5192_v27 = vld [vmem:[#allocation10 + $0xf4] ss:$8 sps:$4 sm:$0xff]  }
 0x3ea   : > { %v1751_v28 = vpop.f32.mrb[12].mxu0 }
 0x3eb   : > { %v4870_v29 = vpop.f32.mrb[13].mxu0  ;;  %v1761_v30 = vsel %vm1757_vm2, %v1751_v28, -inf }
 0x3ec   : > { %1762 = vmax.xlane.f32.xlu1 %v1761_v30  ;;  %v1754_v31 = vpop.f32.mrb[14].mxu0 }
 0x3ed   : > { %v4871_v32 = vpop.f32.mrb[15].mxu0 }
 0x471   : > { %v1760_v34 = vpop.xlane.xlu1 %1759 }
 0x472   : > { %v1764_v35 = vsub.f32 %v1711_v23, %v1760_v34  ;;  %v5184_v23 = vld [vmem:[#allocation10 + $0xd0] ss:$8 sps:$4 sm:$0xff]  }
 0x474   : > { %v1766_v36 = vmul.f32 1.442695, %v1764_v35 }
 0x476   : > { %5387 = vpow2.f32 %v1766_v36 }
 0x479   : > { %v1763_v37 = vpop.xlane.xlu1 %1762 }
 0x47a   : > { %v1765_v40 = vsub.f32 %v1751_v28, %v1763_v37  ;;  %v5190_v28 = vld [vmem:[#allocation10 + $0xf0] ss:$8 sps:$4 sm:$0xff]  }
 0x47c   : > { %v1768_v41 = vmul.f32 1.442695, %v1765_v40 }
 0x47e   : > { %5389 = vpow2.f32 %v1768_v41 }
 0x480   : > { %v5388_v42 = vpop.eup %5387 }
 0x481   : > { %v1770_v43 = vsel %vm1757_vm2, %v5388_v42, 0.0 }
 0x482   : > { %1771 = vadd.xlane.f32.xlu0 %v1770_v43 }
 0x488   : > { %v5390_v44 = vpop.eup %5389 }
 0x489   : > { %v1773_v45 = vsel %vm1757_vm2, %v5390_v44, 0.0 }
 0x48a   : > { %1774 = vadd.xlane.f32.xlu1 %v1773_v45 }
 0x50f   : > { %v1772_v46 = vpop.xlane.xlu0 %1771 }
 0x510   : > { %5391 = vrcp.f32 %v1772_v46 }
 0x517   : > { %v1775_v47 = vpop.xlane.xlu1 %1774 }
 0x518   : > { %5393 = vrcp.f32 %v1775_v47 }
 0x51a   : > { %v5392_v48 = vpop.eup %5391 }
 0x51b   : > { %v1778_v49 = vmul.f32 %v5392_v48, %v5388_v42 }
 0x51d   : > { %v1780_v50 = vpack.c.bf16 %v1778_v49, %v1778_v49 }
 0x51f   : > { %4875 = vmatmul.mubr.msk.bf16.vlgmr.msra.gmra.mrb[4].mxu1 %vm1757_vm2, %v1780_v50 }
 0x520   : > { %4879 = vmatpush3.bf16.msra.mxu1 %v1833_v22  ;;  %4880 = vmatprep.mubr.msk.bf16.mxu1 %vm5723_vm0, %v5722_v0  ;;  %v5181_v22 = vld [vmem:[#allocation10 + $0xc0] ss:$8 sps:$4 sm:$0xff]  }
 0x521   : > { %2197 = vmatprep.subr.bf16.mxu1 %v5147_v51 }
 0x522   : > { %v5394_v52 = vpop.eup %5393 }
 0x523   : > { %v1779_v53 = vmul.f32 %v5394_v52, %v5390_v44 }
 0x525   : > { %v1781_v4 = vpack.c.bf16 %v1779_v53, %v1779_v53 }
 0x527   : > { %4881 = vmatmul.mubr.msk.bf16.vlgmr.msra.gmra.mrb[8].mxu1 %vm1757_vm2, %v1781_v4 }
 0x528   : > { %2198 = vmatpush1.bf16.msra.mxu1 %v5145_v54 }
 0x529   : > { %2199 = vmatprep.subr.bf16.mxu1 %v5150_v55 }
 0x52c   : > { %2200 = vmatpush1.bf16.msra.mxu1 %v5148_v56 }
 0x52d   : > { %2201 = vmatprep.subr.bf16.mxu1 %v5153_v57 }
 0x530   : > { %2202 = vmatpush1.bf16.msra.mxu1 %v5151_v58 }
 0x531   : > { %2203 = vmatprep.subr.bf16.mxu1 %v5156_v59 }
 0x534   : > { %2204 = vmatpush1.bf16.msra.mxu1 %v5154_v60 }
 0x535   : > { %2205 = vmatprep.subr.bf16.mxu1 %v5159_v61 }
 0x538   : > { %2206 = vmatpush1.bf16.msra.mxu1 %v5157_v62 }
 0x539   : > { %2207 = vmatprep.subr.bf16.mxu1 %v5162_v63 }
 0x53c   : > { %2208 = vmatpush1.bf16.msra.mxu1 %v5160_v1 }
 0x53d   : > { %2209 = vmatprep.subr.bf16.mxu1 %v5165_v2 }
 0x540   : > { %2210 = vmatpush1.bf16.msra.mxu1 %v5163_v6 }
 0x541   : > { %2211 = vmatprep.subr.bf16.mxu1 %v5168_v7 }
 0x544   : > { %2212 = vmatpush1.bf16.msra.mxu1 %v5166_v8  ;;  %v2025_v8 = vld [vmem:[%s6361_s6] sm:$0x3] }
 0x545   : > { %2213 = vmatprep.subr.bf16.mxu1 %v5171_v9  ;;  %v2034_v9 = vrot.slane %v2025_v8, %v6087_v16 }
 0x548   : > { %2214 = vmatpush1.bf16.msra.mxu1 %v5169_v10 }
 0x549   : > { %2215 = vmatprep.subr.bf16.mxu1 %v5174_v11 }
 0x54c   : > { %2216 = vmatpush1.bf16.msra.mxu1 %v5172_v12 }
 0x54d   : > { %2217 = vmatprep.subr.bf16.mxu1 %v5177_v14 }
 0x550   : > { %2218 = vmatpush1.bf16.msra.mxu1 %v5175_v18  ;;  %v5429_v18 = vld [vmem:[%s6048_s12] sm:$0xff] }
 0x551   : > { %2219 = vmatprep.subr.bf16.mxu1 %v5180_v19 }
 0x554   : > { %2220 = vmatpush1.bf16.msra.mxu1 %v5178_v20 }
 0x555   : > { %2221 = vmatprep.subr.bf16.mxu1 %v5183_v21  ;;  %v5430_v21 = vld [vmem:[%s6048_s12 + $0x8] sm:$0xff]  ;;  %s6400_s12 = sld [smem:[#allocation24_spill]] }
 0x558   : > { %2222 = vmatpush1.bf16.msra.mxu1 %v5181_v22 }
 0x559   : > { %2223 = vmatprep.subr.bf16.mxu1 %v5186_v24  ;;  %v2286_v24 = vld [vmem:[#allocation11] sm:$0xff] }
 0x55c   : > { %2224 = vmatpush1.bf16.msra.mxu1 %v5184_v23 }
 0x55d   : > { %2225 = vmatprep.subr.bf16.mxu1 %v5189_v25  ;;  %v2290_v25 = vld [vmem:[#allocation11 + $0x20] sm:$0xff] }
 0x560   : > { %2226 = vmatpush1.bf16.msra.mxu1 %v5187_v26  ;;  %v2287_v26 = vld [vmem:[#allocation11 + $0x8] sm:$0xff] }
 0x561   : > { %2227 = vmatprep.subr.bf16.mxu1 %v5192_v27  ;;  %v4581_v27 = vcombine.low %v2286_v24, %v2290_v25 }
 0x564   : > { %2228 = vmatpush1.bf16.msra.mxu1 %v5190_v28  ;;  %v4582_v28 = vcombine.high %v2286_v24, %v2290_v25  ;;  %v2346_v24 = vld [vmem:[#allocation11 + $0x1e0] sm:$0xff]  ;;  %v2343_v25 = vld [vmem:[#allocation11 + $0x1c8] sm:$0xff] }
 0x566   : > { %3096 = vmatprep.subr.bf16.mxu0 %v4582_v28 }
 0x567   : > { %3097 = vmatpush1.bf16.msra.mxu0 %v4581_v27 }
 0x5f2   : > { %v1823_v29 = vpop.f32.mrb[4].mxu1 }
 0x5f3   : > { %v4876_v30 = vpop.f32.mrb[5].mxu1  ;;  %v1875_v34 = vcombine.high %v1823_v29, %v5722_v0  ;;  %v1882_v36 = vrot.slane %v1823_v29, %v6127_v13  ;;  %v2291_v29 = vld [vmem:[#allocation11 + $0x28] sm:$0xff] }
 0x5f4   : > { %v1826_v31 = vpop.f32.mrb[6].mxu1  ;;  %v2294_v30 = vld [vmem:[#allocation11 + $0x40] sm:$0xff] }
 0x5f5   : > { %v4877_v32 = vpop.f32.mrb[7].mxu1  ;;  %v1889_v43 = vrot.slane %v1875_v34, %v6127_v13  ;;  %v2298_v31 = vld [vmem:[#allocation11 + $0x60] sm:$0xff]  ;;  %v4584_v34 = vcombine.high %v2287_v26, %v2291_v29 }
 0x5f6   : > { %v4583_v32 = vcombine.low %v2287_v26, %v2291_v29  ;;  %v2347_v26 = vld [vmem:[#allocation11 + $0x1e8] sm:$0xff] }
 0x5f7   : > { %3137 = vmatprep.subr.bf16.mxu1 %v4584_v34  ;;  %v2351_v34 = vld [vmem:[#allocation11 + $0x208] sm:$0xff] }
 0x5fa   : > { %v1869_v35 = vpop.f32.mrb[8].mxu1 }
 0x5fb   : > { %v1890_v37 = vcombine.high %v1869_v35, %v5722_v0  ;;  %v1897_v40 = vrot.slane %v1869_v35, %v6127_v13  ;;  %v4882_v41 = vpop.f32.mrb[9].mxu1  ;;  %v4590_v35 = vcombine.high %v2294_v30, %v2298_v31 }
 0x5fc   : > { %v1872_v42 = vpop.f32.mrb[10].mxu1 }
 0x5fd   : > { %v1904_v44 = vrot.slane %v1890_v37, %v6127_v13  ;;  %v1905_v45 = vcombine.low %v1882_v36, %v1897_v40  ;;  %v1906_v46 = vcombine.high %v1882_v36, %v1897_v40  ;;  %v4883_v47 = vpop.f32.mrb[11].mxu1  ;;  %v2295_v36 = vld [vmem:[#allocation11 + $0x48] sm:$0xff]  ;;  %v2302_v40 = vld [vmem:[#allocation11 + $0x80] sm:$0xff]  ;;  %3098 = vmatprep.subr.bf16.mxu0 %v4590_v35 }
 0x5fe   : > { %v2299_v37 = vld [vmem:[#allocation11 + $0x68] sm:$0xff]  ;;  %v2306_v42 = vld [vmem:[#allocation11 + $0xa0] sm:$0xff] }
 0x5ff   : > { %v1913_v48 = vrot.slane %v1905_v45, %v6132_v33  ;;  %v1920_v49 = vrot.slane %v1906_v46, %v6132_v33  ;;  %v1921_v50 = vcombine.low %v1889_v43, %v1904_v44  ;;  %v1922_v51 = vcombine.high %v1889_v43, %v1904_v44  ;;  %v2303_v43 = vld [vmem:[#allocation11 + $0x88] sm:$0xff] }
 0x600   : > { %v4592_v41 = vcombine.high %v2295_v36, %v2299_v37  ;;  %v2307_v44 = vld [vmem:[#allocation11 + $0xa8] sm:$0xff]  ;;  %v4589_v45 = vcombine.low %v2294_v30, %v2298_v31  ;;  %v4591_v46 = vcombine.low %v2295_v36, %v2299_v37  ;;  %v4598_v47 = vcombine.high %v2302_v40, %v2306_v42  ;;  %v2350_v31 = vld [vmem:[#allocation11 + $0x200] sm:$0xff] }
 0x601   : > { %v1929_v52 = vrot.slane %v1921_v50, %v6132_v33  ;;  %v1936_v0 = vrot.slane %v1922_v51, %v6132_v33  ;;  %v1941_v53 = vcombine.low %v1913_v48, %v1920_v49  ;;  %v4547_v54 = vcombine.high %v1913_v48, %v1920_v49  ;;  %v2310_v49 = vld [vmem:[#allocation11 + $0xc0] sm:$0xff]  ;;  %v2311_v51 = vld [vmem:[#allocation11 + $0xc8] sm:$0xff] }
 0x602   : > { %v4600_v48 = vcombine.high %v2303_v43, %v2307_v44  ;;  %v2314_v50 = vld [vmem:[#allocation11 + $0xe0] sm:$0xff]  ;;  %3099 = vmatpush1.bf16.msra.mxu0 %v4589_v45  ;;  %v4640_v30 = vcombine.high %v2343_v25, %v2347_v26  ;;  %v2355_v35 = vld [vmem:[#allocation11 + $0x228] sm:$0xff]  ;;  %v4639_v37 = vcombine.low %v2343_v25, %v2347_v26 }
 0x603   : > { %v1948_v4 = vrot.slane %v1941_v53, %v6127_v13  ;;  %v1956_v55 = vrot.slane %v4547_v54, %v6127_v13  ;;  %v1957_v56 = vcombine.low %v1929_v52, %v1936_v0  ;;  %v4548_v57 = vcombine.high %v1929_v52, %v1936_v0  ;;  %v2315_v52 = vld [vmem:[#allocation11 + $0xe8] sm:$0xff]  ;;  %3100 = vmatprep.subr.bf16.mxu0 %v4598_v47  ;;  %v2390_v25 = vld [vmem:[#allocation11 + $0x340] sm:$0xff] }
 0x604   : > { %v4597_v0 = vcombine.low %v2302_v40, %v2306_v42  ;;  %v4599_v53 = vcombine.low %v2303_v43, %v2307_v44  ;;  %v4606_v54 = vcombine.high %v2310_v49, %v2314_v50  ;;  %v2358_v42 = vld [vmem:[#allocation11 + $0x240] sm:$0xff]  ;;  %v2359_v44 = vld [vmem:[#allocation11 + $0x248] sm:$0xff]  ;;  %v4647_v47 = vcombine.low %v2351_v34, %v2355_v35 }
 0x605   : > { %v1964_v58 = vrot.slane %v1957_v56, %v6127_v13  ;;  %v1972_v59 = vrot.slane %v4548_v57, %v6127_v13  ;;  %v1973_v60 = vcombine.low %v1948_v4, %v1956_v55  ;;  %v2030_v13 = vrot.slane %v2025_v8, %v6090_v17  ;;  %v2318_v55 = vld [vmem:[#allocation11 + $0x100] sm:$0xff]  ;;  %v2319_v57 = vld [vmem:[#allocation11 + $0x108] sm:$0xff] }
 0x606   : > { %v4608_v4 = vcombine.high %v2311_v51, %v2315_v52  ;;  %v2322_v56 = vld [vmem:[#allocation11 + $0x120] sm:$0xff]  ;;  %3101 = vmatpush1.bf16.msra.mxu0 %v4597_v0  ;;  %v2363_v45 = vld [vmem:[#allocation11 + $0x268] sm:$0xff] }
 0x607   : > { %v1981_v61 = vcombine.low %v1964_v58, %v1972_v59  ;;  %v1980_v62 = vrot.slane %v1973_v60, %v6132_v33  ;;  %v2323_v58 = vld [vmem:[#allocation11 + $0x128] sm:$0xff]  ;;  %v4605_v59 = vcombine.low %v2310_v49, %v2314_v50  ;;  %3102 = vmatprep.subr.bf16.mxu0 %v4606_v54  ;;  %v4607_v60 = vcombine.low %v2311_v51, %v2315_v52  ;;  %v2362_v43 = vld [vmem:[#allocation11 + $0x260] sm:$0xff] }
 0x608   : > { %v4615_v8 = vcombine.low %v2319_v57, %v2323_v58  ;;  %v4656_v49 = vcombine.high %v2359_v44, %v2363_v45  ;;  %v2366_v50 = vld [vmem:[#allocation11 + $0x280] sm:$0xff]  ;;  %v2367_v52 = vld [vmem:[#allocation11 + $0x288] sm:$0xff]  ;;  %v4655_v54 = vcombine.low %v2359_v44, %v2363_v45 }
 0x609   : > { %v1988_v63 = vrot.slane %v1981_v61, %v6132_v33  ;;  %v4614_v61 = vcombine.high %v2318_v55, %v2322_v56  ;;  %v2370_v51 = vld [vmem:[#allocation11 + $0x2a0] sm:$0xff]  ;;  %v2371_v0 = vld [vmem:[#allocation11 + $0x2a8] sm:$0xff] }
 0x60a   : > { %3103 = vmatpush1.bf16.msra.mxu0 %v4605_v59  ;;  %v2394_v26 = vld [vmem:[#allocation11 + $0x360] sm:$0xff] }
 0x60b   : > { %v1990_v1 = vcombine.high %v1980_v62, %v1988_v63  ;;  %v1989_v2 = vcombine.low %v1980_v62, %v1988_v63  ;;  %v4616_v62 = vcombine.high %v2319_v57, %v2323_v58  ;;  %v2326_v63 = vld [vmem:[#allocation11 + $0x140] sm:$0xff]  ;;  %3104 = vmatprep.subr.bf16.mxu0 %v4614_v61  ;;  %v4663_v57 = vcombine.low %v2367_v52, %v2371_v0 }
 0x60c   : > { %v2406_v44 = vld [vmem:[#allocation11 + $0x3c0] sm:$0xff] }
 0x60d   : > { %v1992_v6 = vpack.c.bf16 %v1990_v1, %v1990_v1  ;;  %v1991_v7 = vpack.c.bf16 %v1989_v2, %v1989_v2  ;;  %v2330_v1 = vld [vmem:[#allocation11 + $0x160] sm:$0xff]  ;;  %v2327_v2 = vld [vmem:[#allocation11 + $0x148] sm:$0xff] }
 0x60e   : > { %v2410_v45 = vld [vmem:[#allocation11 + $0x3e0] sm:$0xff] }
 0x60f   : > { %2229 = vmatprep.mubr.bf16.mxu1 %v1992_v6  ;;  %v2331_v6 = vld [vmem:[#allocation11 + $0x168] sm:$0xff] }
 0x610   : > { %2230 = vmatmul.mubr.bf16.vlgmr.msra.gmra.mrb[12].mxu1 %v1991_v7  ;;  %v4613_v7 = vcombine.low %v2318_v55, %v2322_v56  ;;  %v4664_v55 = vcombine.high %v2367_v52, %v2371_v0  ;;  %v4661_v56 = vcombine.low %v2366_v50, %v2370_v51  ;;  %v2288_v52 = vld [vmem:[#allocation11 + $0x10] sm:$0xff] }
 0x611   : > { %3138 = vmatpush1.bf16.msra.mxu1 %v4583_v32  ;;  %v2354_v32 = vld [vmem:[#allocation11 + $0x220] sm:$0xff]  ;;  %v2292_v0 = vld [vmem:[#allocation11 + $0x30] sm:$0xff] }
 0x612   : > { %3139 = vmatprep.subr.bf16.mxu1 %v4592_v41  ;;  %3105 = vmatpush1.bf16.msra.mxu0 %v4613_v7  ;;  %v4646_v40 = vcombine.high %v2350_v31, %v2354_v32  ;;  %v4648_v41 = vcombine.high %v2351_v34, %v2355_v35  ;;  %v2375_v7 = vld [vmem:[#allocation11 + $0x2c8] sm:$0xff]  ;;  %v2398_v34 = vld [vmem:[#allocation11 + $0x380] sm:$0xff] }
 0x613   : > { %v2402_v35 = vld [vmem:[#allocation11 + $0x3a0] sm:$0xff] }
 0x615   : > { %3140 = vmatpush1.bf16.msra.mxu1 %v4591_v46  ;;  %v4645_v46 = vcombine.low %v2350_v31, %v2354_v32 }
 0x616   : > { %3141 = vmatprep.subr.bf16.mxu1 %v4600_v48  ;;  %v4654_v48 = vcombine.high %v2358_v42, %v2362_v43 }
 0x619   : > { %3142 = vmatpush1.bf16.msra.mxu1 %v4599_v53  ;;  %v4653_v53 = vcombine.low %v2358_v42, %v2362_v43 }
 0x61a   : > { %3143 = vmatprep.subr.bf16.mxu1 %v4608_v4  ;;  %v4662_v4 = vcombine.high %v2366_v50, %v2370_v51 }
 0x61d   : > { %3144 = vmatpush1.bf16.msra.mxu1 %v4607_v60 }
 0x61e   : > { %3145 = vmatprep.subr.bf16.mxu1 %v4616_v62 }
 0x621   : > { %3146 = vmatpush1.bf16.msra.mxu1 %v4615_v8 }
 0x6e3   : > { %v2231_v10 = vpop.f32.mrb[12].mxu1 }
 0x6e4   : > { %v2232_v11 = vadd.f32 %v2231_v10, %v2030_v13  ;;  %v2233_v12 = vpop.f32.mrb[13].mxu1  ;;  %v4622_v13 = vcombine.high %v2326_v63, %v2330_v1  ;;  %v2334_v10 = vld [vmem:[#allocation11 + $0x180] sm:$0xff] }
 0x6e5   : > { %v2234_v14 = vadd.f32 %v2233_v12, %v2034_v9  ;;  %v2235_v33 = vpop.f32.mrb[14].mxu1  ;;  %v4624_v9 = vcombine.high %v2327_v2, %v2331_v6  ;;  %v2335_v12 = vld [vmem:[#allocation11 + $0x188] sm:$0xff] }
 0x6e6   : > { %v6222_v19 = vadd.f32 %v5429_v18, %v2232_v11  ;;  %v2236_v20 = vpop.f32.mrb[15].mxu1  ;;  %v2338_v11 = vld [vmem:[#allocation11 + $0x1a0] sm:$0xff]  ;;  %v4621_v33 = vcombine.low %v2326_v63, %v2330_v1  ;;  %3106 = vmatprep.subr.bf16.mxu0 %v4622_v13  ;;  %v4623_v18 = vcombine.low %v2327_v2, %v2331_v6  ;;  %v2379_v13 = vld [vmem:[#allocation11 + $0x2e8] sm:$0xff] }
 0x6e7   : > { %v6225_v22 = vadd.f32 %v5430_v21, %v2234_v14  ;;  %v2339_v14 = vld [vmem:[#allocation11 + $0x1a8] sm:$0xff]  ;;  %v4630_v20 = vcombine.high %v2334_v10, %v2338_v11  ;;  %3147 = vmatprep.subr.bf16.mxu1 %v4624_v9  ;;  %v4629_v27 = vcombine.low %v2334_v10, %v2338_v11  ;;  %v2374_v2 = vld [vmem:[#allocation11 + $0x2c0] sm:$0xff]  ;;  %v4671_v10 = vcombine.low %v2375_v7, %v2379_v13 }
 0x6e8   : > { %v4632_v21 = vcombine.high %v2335_v12, %v2339_v14  ;;  %3107 = vmatpush1.bf16.msra.mxu0 %v4621_v33  ;;  %3148 = vmatpush1.bf16.msra.mxu1 %v4623_v18  ;;  %v4631_v28 = vcombine.low %v2335_v12, %v2339_v14  ;;  %v2378_v6 = vld [vmem:[#allocation11 + $0x2e0] sm:$0xff]  ;;  %v4672_v11 = vcombine.high %v2375_v7, %v2379_v13  ;;  %v2383_v33 = vld [vmem:[#allocation11 + $0x308] sm:$0xff] }
 0x6e9   : > { %v2242_v23 = vadd.f32 %v6225_v22, %v6222_v19  ;;  %3108 = vmatprep.subr.bf16.mxu0 %v4630_v20  ;;  %v4670_v8 = vcombine.high %v2374_v2, %v2378_v6  ;;  %v4669_v9 = vcombine.low %v2374_v2, %v2378_v6  ;;  %v2382_v12 = vld [vmem:[#allocation11 + $0x300] sm:$0xff]  ;;  %v2387_v20 = vld [vmem:[#allocation11 + $0x328] sm:$0xff] }
 0x6ea   : > { %3149 = vmatprep.subr.bf16.mxu1 %v4632_v21  ;;  %v2386_v14 = vld [vmem:[#allocation11 + $0x320] sm:$0xff] }
 0x6eb   : > { %2243 = vadd.xlane.f32.xlu0 %v2242_v23  ;;  %v2342_v23 = vld [vmem:[#allocation11 + $0x1c0] sm:$0xff]  ;;  %v4678_v18 = vcombine.high %v2382_v12, %v2386_v14  ;;  %v4677_v21 = vcombine.low %v2382_v12, %v2386_v14 }
 0x6ec   : > { %v4638_v29 = vcombine.high %v2342_v23, %v2346_v24  ;;  %3109 = vmatpush1.bf16.msra.mxu0 %v4629_v27  ;;  %v4637_v36 = vcombine.low %v2342_v23, %v2346_v24  ;;  %3150 = vmatpush1.bf16.msra.mxu1 %v4631_v28  ;;  %v4679_v23 = vcombine.low %v2383_v33, %v2387_v20  ;;  %v2391_v27 = vld [vmem:[#allocation11 + $0x348] sm:$0xff] }
 0x6ed   : > { %3151 = vmatprep.subr.bf16.mxu1 %v4640_v30  ;;  %v4680_v24 = vcombine.high %v2383_v33, %v2387_v20  ;;  %v4686_v28 = vcombine.high %v2390_v25, %v2394_v26  ;;  %v4685_v30 = vcombine.low %v2390_v25, %v2394_v26  ;;  %v2300_v20 = vld [vmem:[#allocation11 + $0x70] sm:$0xff] }
 0x6ee   : > { %3110 = vmatprep.subr.bf16.mxu0 %v4638_v29  ;;  %v2395_v29 = vld [vmem:[#allocation11 + $0x368] sm:$0xff]  ;;  %v2304_v26 = vld [vmem:[#allocation11 + $0x90] sm:$0xff] }
 0x6ef   : > { %v4687_v31 = vcombine.low %v2391_v27, %v2395_v29  ;;  %v4688_v32 = vcombine.high %v2391_v27, %v2395_v29  ;;  %v2308_v27 = vld [vmem:[#allocation11 + $0xb0] sm:$0xff]  ;;  %v2309_v29 = vld [vmem:[#allocation11 + $0xb8] sm:$0xff] }
 0x6f0   : > { %3111 = vmatpush1.bf16.msra.mxu0 %v4637_v36  ;;  %3152 = vmatpush1.bf16.msra.mxu1 %v4639_v37  ;;  %v2399_v36 = vld [vmem:[#allocation11 + $0x388] sm:$0xff]  ;;  %v4694_v37 = vcombine.high %v2398_v34, %v2402_v35 }
 0x6f1   : > { %3112 = vmatprep.subr.bf16.mxu0 %v4646_v40  ;;  %3153 = vmatprep.subr.bf16.mxu1 %v4648_v41  ;;  %v2403_v40 = vld [vmem:[#allocation11 + $0x3a8] sm:$0xff]  ;;  %v4693_v41 = vcombine.low %v2398_v34, %v2402_v35  ;;  %v2312_v35 = vld [vmem:[#allocation11 + $0xd0] sm:$0xff] }
 0x6f2   : > { %v4695_v42 = vcombine.low %v2399_v36, %v2403_v40  ;;  %v4696_v43 = vcombine.high %v2399_v36, %v2403_v40  ;;  %v2316_v36 = vld [vmem:[#allocation11 + $0xf0] sm:$0xff]  ;;  %v2317_v40 = vld [vmem:[#allocation11 + $0xf8] sm:$0xff] }
 0x6f4   : > { %3113 = vmatpush1.bf16.msra.mxu0 %v4645_v46  ;;  %3154 = vmatpush1.bf16.msra.mxu1 %v4647_v47  ;;  %v2407_v46 = vld [vmem:[#allocation11 + $0x3c8] sm:$0xff]  ;;  %v4702_v47 = vcombine.high %v2406_v44, %v2410_v45 }
 0x6f5   : > { %3114 = vmatprep.subr.bf16.mxu0 %v4654_v48  ;;  %3155 = vmatprep.subr.bf16.mxu1 %v4656_v49  ;;  %v2411_v48 = vld [vmem:[#allocation11 + $0x3e8] sm:$0xff]  ;;  %v4701_v49 = vcombine.low %v2406_v44, %v2410_v45  ;;  %v2320_v45 = vld [vmem:[#allocation11 + $0x110] sm:$0xff] }
 0x6f6   : > { %v4704_v50 = vcombine.high %v2407_v46, %v2411_v48  ;;  %v4703_v51 = vcombine.low %v2407_v46, %v2411_v48  ;;  %v2324_v46 = vld [vmem:[#allocation11 + $0x130] sm:$0xff]  ;;  %v2325_v48 = vld [vmem:[#allocation11 + $0x138] sm:$0xff] }
 0x6f8   : > { %3115 = vmatpush1.bf16.msra.mxu0 %v4653_v53  ;;  %3156 = vmatpush1.bf16.msra.mxu1 %v4655_v54  ;;  %v2289_v53 = vld [vmem:[#allocation11 + $0x18] sm:$0xff]  ;;  %v4586_v54 = vcombine.high %v2288_v52, %v2292_v0 }
 0x6f9   : > { %3116 = vmatprep.subr.bf16.mxu0 %v4662_v4  ;;  %3157 = vmatprep.subr.bf16.mxu1 %v4664_v55  ;;  %v2293_v4 = vld [vmem:[#allocation11 + $0x38] sm:$0xff]  ;;  %v4585_v55 = vcombine.low %v2288_v52, %v2292_v0  ;;  %v2328_v0 = vld [vmem:[#allocation11 + $0x150] sm:$0xff] }
 0x6fc   : > { %3117 = vmatpush1.bf16.msra.mxu0 %v4661_v56  ;;  %3158 = vmatpush1.bf16.msra.mxu1 %v4663_v57  ;;  %v4587_v56 = vcombine.low %v2289_v53, %v2293_v4  ;;  %v4588_v57 = vcombine.high %v2289_v53, %v2293_v4  ;;  %v2332_v53 = vld [vmem:[#allocation11 + $0x170] sm:$0xff]  ;;  %v2333_v4 = vld [vmem:[#allocation11 + $0x178] sm:$0xff] }
 0x6fd   : > { %3118 = vmatprep.subr.bf16.mxu0 %v4670_v8  ;;  %3159 = vmatprep.subr.bf16.mxu1 %v4672_v11 }
 0x700   : > { %3119 = vmatpush1.bf16.msra.mxu0 %v4669_v9  ;;  %3160 = vmatpush1.bf16.msra.mxu1 %v4671_v10 }
 0x701   : > { %3120 = vmatprep.subr.bf16.mxu0 %v4678_v18  ;;  %3161 = vmatprep.subr.bf16.mxu1 %v4680_v24  ;;  %v2296_v18 = vld [vmem:[#allocation11 + $0x50] sm:$0xff] }
 0x704   : > { %3121 = vmatpush1.bf16.msra.mxu0 %v4677_v21  ;;  %3162 = vmatpush1.bf16.msra.mxu1 %v4679_v23  ;;  %v2297_v21 = vld [vmem:[#allocation11 + $0x58] sm:$0xff] }
 0x705   : > { %3122 = vmatprep.subr.bf16.mxu0 %v4686_v28  ;;  %3163 = vmatprep.subr.bf16.mxu1 %v4688_v32  ;;  %v2301_v23 = vld [vmem:[#allocation11 + $0x78] sm:$0xff]  ;;  %v4602_v32 = vcombine.high %v2304_v26, %v2308_v27 }
 0x706   : > { %v2305_v28 = vld [vmem:[#allocation11 + $0x98] sm:$0xff] }
 0x707   : > { %v4604_v34 = vcombine.high %v2305_v28, %v2309_v29 }
 0x708   : > { %3123 = vmatpush1.bf16.msra.mxu0 %v4685_v30  ;;  %3164 = vmatpush1.bf16.msra.mxu1 %v4687_v31  ;;  %v4593_v30 = vcombine.low %v2296_v18, %v2300_v20  ;;  %v4595_v31 = vcombine.low %v2297_v21, %v2301_v23 }
 0x709   : > { %3124 = vmatprep.subr.bf16.mxu0 %v4694_v37  ;;  %3165 = vmatprep.subr.bf16.mxu1 %v4696_v43  ;;  %v2313_v37 = vld [vmem:[#allocation11 + $0xd8] sm:$0xff]  ;;  %v4610_v43 = vcombine.high %v2312_v35, %v2316_v36 }
 0x70a   : > { %v4612_v44 = vcombine.high %v2313_v37, %v2317_v40 }
 0x70c   : > { %3125 = vmatpush1.bf16.msra.mxu0 %v4693_v41  ;;  %3166 = vmatpush1.bf16.msra.mxu1 %v4695_v42  ;;  %v4601_v41 = vcombine.low %v2304_v26, %v2308_v27  ;;  %v4603_v42 = vcombine.low %v2305_v28, %v2309_v29  ;;  %v2360_v28 = vld [vmem:[#allocation11 + $0x250] sm:$0xff] }
 0x70d   : > { %3126 = vmatprep.subr.bf16.mxu0 %v4702_v47  ;;  %3167 = vmatprep.subr.bf16.mxu1 %v4704_v50  ;;  %v2321_v47 = vld [vmem:[#allocation11 + $0x118] sm:$0xff]  ;;  %v4611_v50 = vcombine.low %v2313_v37, %v2317_v40  ;;  %v2364_v29 = vld [vmem:[#allocation11 + $0x270] sm:$0xff] }
 0x70e   : > { %v4620_v52 = vcombine.high %v2321_v47, %v2325_v48  ;;  %v2368_v37 = vld [vmem:[#allocation11 + $0x290] sm:$0xff] }
 0x70f   : > { %v2372_v40 = vld [vmem:[#allocation11 + $0x2b0] sm:$0xff] }
 0x710   : > { %3127 = vmatpush1.bf16.msra.mxu0 %v4701_v49  ;;  %3168 = vmatpush1.bf16.msra.mxu1 %v4703_v51  ;;  %v4609_v49 = vcombine.low %v2312_v35, %v2316_v36  ;;  %v4618_v51 = vcombine.high %v2320_v45, %v2324_v46  ;;  %v4658_v35 = vcombine.high %v2360_v28, %v2364_v29 }
 0x711   : > { %3178 = vmatprep.subr.bf16.mxu0 %v4586_v54  ;;  %3219 = vmatprep.subr.bf16.mxu1 %v4588_v57  ;;  %v2329_v54 = vld [vmem:[#allocation11 + $0x158] sm:$0xff]  ;;  %v4626_v57 = vcombine.high %v2328_v0, %v2332_v53 }
 0x778   : > { %v2244_v58 = vpop.xlane.xlu0 %2243 }
 0x779   : > { %v2245_v59 = vmul.f32 0.00390625, %v2244_v58 }
 0x77b   : > { %v6230_v60 = vsub.f32 %v6222_v19, %v2245_v59  ;;  %v6233_v61 = vsub.f32 %v6225_v22, %v2245_v59 }
 0x77d   : > { %v2248_v62 = vmul.f32 %v6230_v60, %v6230_v60  ;;  %v2249_v63 = vmul.f32 %v6233_v61, %v6233_v61 }
 0x77f   : > { %v2250_v1 = vadd.f32 %v2249_v63, %v2248_v62  ;;  %v2240_v63 = vld [vmem:[%s6398_s10] sm:$0x3] }
 0x780   : > { %v2266_v2 = vrot.slane %v2240_v63, %v6087_v16  ;;  %v2262_v6 = vrot.slane %v2240_v63, %v6090_v17  ;;  %v2337_v63 = vld [vmem:[#allocation11 + $0x198] sm:$0xff] }
 0x781   : > { %2251 = vadd.xlane.f32.xlu1 %v2250_v1  ;;  %v2241_v1 = vld [vmem:[%s6399_s29] sm:$0x3]  ;;  %s6311_s29 = scalar_lea.hbm %s6402_s22, %s4851_s23 }
 0x782   : > { %v2279_v9 = vrot.slane %v2241_v1, %v6087_v16  ;;  %v2275_v10 = vrot.slane %v2241_v1, %v6090_v17  ;;  %v2341_v1 = vld [vmem:[#allocation11 + $0x1b8] sm:$0xff] }
 0x80e   : > { %v2252_v58 = vpop.xlane.xlu1 %2251 }
 0x80f   : > { %v2253_v59 = vmul.f32 0.00390625, %v2252_v58  ;;  %v4628_v58 = vcombine.high %v2329_v54, %v2333_v4 }
 0x811   : > { %v2254_v62 = vadd.f32 1e-05, %v2253_v59  ;;  %v2336_v59 = vld [vmem:[#allocation11 + $0x190] sm:$0xff] }
 0x813   : > { %5395 = vrsqrt.f32 %v2254_v62  ;;  %v2340_v62 = vld [vmem:[#allocation11 + $0x1b0] sm:$0xff] }
 0x81d   : > { %v5396_v7 = vpop.eup %5395 }
 0x81e   : > { %v2256_v8 = vmul.f32 %v5396_v7, %v6230_v60  ;;  %v2257_v13 = vmul.f32 %v5396_v7, %v6233_v61  ;;  %v4594_v60 = vcombine.high %v2296_v18, %v2300_v20  ;;  %v4596_v61 = vcombine.high %v2297_v21, %v2301_v23  ;;  %v2352_v20 = vld [vmem:[#allocation11 + $0x210] sm:$0xff]  ;;  %v2353_v23 = vld [vmem:[#allocation11 + $0x218] sm:$0xff] }
 0x81f   : > { %v4634_v7 = vcombine.high %v2336_v59, %v2340_v62  ;;  %v2356_v21 = vld [vmem:[#allocation11 + $0x230] sm:$0xff] }
 0x820   : > { %v2270_v11 = vmul.f32 %v2266_v2, %v2257_v13  ;;  %v2269_v12 = vmul.f32 %v2262_v6, %v2256_v8  ;;  %v4625_v2 = vcombine.low %v2328_v0, %v2332_v53  ;;  %v4627_v6 = vcombine.low %v2329_v54, %v2333_v4  ;;  %v2344_v13 = vld [vmem:[#allocation11 + $0x1d0] sm:$0xff] }
 0x821   : > { %v4636_v8 = vcombine.high %v2337_v63, %v2341_v1  ;;  %v2384_v54 = vld [vmem:[#allocation11 + $0x310] sm:$0xff] }
 0x822   : > { %v2283_v14 = vadd.f32 %v2279_v9, %v2270_v11  ;;  %v2282_v33 = vadd.f32 %v2275_v10, %v2269_v12  ;;  %v2348_v9 = vld [vmem:[#allocation11 + $0x1f0] sm:$0xff]  ;;  %v2345_v10 = vld [vmem:[#allocation11 + $0x1d8] sm:$0xff]  ;;  %v4633_v12 = vcombine.low %v2336_v59, %v2340_v62 }
 0x823   : > { %v2349_v11 = vld [vmem:[#allocation11 + $0x1f8] sm:$0xff]  ;;  %v4641_v26 = vcombine.low %v2344_v13, %v2348_v9  ;;  %v2388_v4 = vld [vmem:[#allocation11 + $0x330] sm:$0xff] }
 0x824   : > { %v2285_v24 = vpack.c.bf16 %v2283_v14, %v2283_v14  ;;  %v6251_v25 = vpack.c.bf16 %v2282_v33, %v2282_v33  ;;  %v4635_v14 = vcombine.low %v2337_v63, %v2341_v1  ;;  %v4642_v33 = vcombine.high %v2344_v13, %v2348_v9  ;;  %v2392_v63 = vld [vmem:[#allocation11 + $0x350] sm:$0xff] }
 0x825   : > { %v4644_v18 = vcombine.high %v2345_v10, %v2349_v11  ;;  %v4682_v59 = vcombine.high %v2384_v54, %v2388_v4  ;;  %v2396_v1 = vld [vmem:[#allocation11 + $0x370] sm:$0xff] }
 0x826   : > { %3128 = vmatprep.mubr.bf16.mxu0 %v2285_v24  ;;  %3169 = vmatprep.mubr.bf16.mxu1 %v2285_v24  ;;  %v4690_v13 = vcombine.high %v2392_v63, %v2396_v1 }
 0x827   : > { %3129 = vmatmul.mubr.bf16.vlgmr.msra.gmra.mrb[16].mxu0 %v6251_v25  ;;  %3170 = vmatmul.mubr.bf16.vlgmr.msra.gmra.mrb[16].mxu1 %v6251_v25 }
 0x828   : > { %3179 = vmatpush1.bf16.msra.mxu0 %v4585_v55  ;;  %3220 = vmatpush1.bf16.msra.mxu1 %v4587_v56  ;;  %v4617_v55 = vcombine.low %v2320_v45, %v2324_v46  ;;  %v4619_v56 = vcombine.low %v2321_v47, %v2325_v48  ;;  %v4666_v45 = vcombine.high %v2368_v37, %v2372_v40  ;;  %v2376_v47 = vld [vmem:[#allocation11 + $0x2d0] sm:$0xff] }
 0x829   : > { %3210 = vmatprep.mubr.bf16.mxu0 %v2285_v24  ;;  %3251 = vmatprep.mubr.bf16.mxu1 %v2285_v24  ;;  %v2357_v24 = vld [vmem:[#allocation11 + $0x238] sm:$0xff]  ;;  %v2380_v48 = vld [vmem:[#allocation11 + $0x2f0] sm:$0xff] }
 0x82a   : > { %3180 = vmatprep.subr.bf16.mxu0 %v4594_v60  ;;  %3221 = vmatprep.subr.bf16.mxu1 %v4596_v61  ;;  %v4643_v60 = vcombine.low %v2345_v10, %v2349_v11  ;;  %v4650_v61 = vcombine.high %v2352_v20, %v2356_v21  ;;  %v4652_v27 = vcombine.high %v2353_v23, %v2357_v24  ;;  %v2400_v10 = vld [vmem:[#allocation11 + $0x390] sm:$0xff] }
 0x82b   : > { %v4674_v0 = vcombine.high %v2376_v47, %v2380_v48  ;;  %v2404_v11 = vld [vmem:[#allocation11 + $0x3b0] sm:$0xff] }
 0x82c   : > { %3181 = vmatpush1.bf16.msra.mxu0 %v4593_v30  ;;  %3222 = vmatpush1.bf16.msra.mxu1 %v4595_v31  ;;  %v2361_v30 = vld [vmem:[#allocation11 + $0x258] sm:$0xff] }
 0x82d   : > { %3182 = vmatprep.subr.bf16.mxu0 %v4602_v32  ;;  %3223 = vmatprep.subr.bf16.mxu1 %v4604_v34  ;;  %v2365_v31 = vld [vmem:[#allocation11 + $0x278] sm:$0xff]  ;;  %v4649_v32 = vcombine.low %v2352_v20, %v2356_v21  ;;  %v4651_v34 = vcombine.low %v2353_v23, %v2357_v24  ;;  %v4698_v20 = vcombine.high %v2400_v10, %v2404_v11  ;;  %v2408_v23 = vld [vmem:[#allocation11 + $0x3d0] sm:$0xff] }
 0x82e   : > { %v4660_v36 = vcombine.high %v2361_v30, %v2365_v31  ;;  %v2412_v24 = vld [vmem:[#allocation11 + $0x3f0] sm:$0xff] }
 0x830   : > { %3183 = vmatpush1.bf16.msra.mxu0 %v4601_v41  ;;  %3224 = vmatpush1.bf16.msra.mxu1 %v4603_v42  ;;  %v2369_v41 = vld [vmem:[#allocation11 + $0x298] sm:$0xff] }
 0x831   : > { %3184 = vmatprep.subr.bf16.mxu0 %v4610_v43  ;;  %3225 = vmatprep.subr.bf16.mxu1 %v4612_v44  ;;  %v2373_v42 = vld [vmem:[#allocation11 + $0x2b8] sm:$0xff]  ;;  %v4657_v43 = vcombine.low %v2360_v28, %v2364_v29  ;;  %v4659_v44 = vcombine.low %v2361_v30, %v2365_v31  ;;  %v4706_v28 = vcombine.high %v2408_v23, %v2412_v24 }
 0x832   : > { %v4668_v46 = vcombine.high %v2369_v41, %v2373_v42  ;;  %v4705_v30 = vcombine.low %v2408_v23, %v2412_v24  ;;  %v5264_v23 = vld [vmem:[#allocation13 + $0x1b4] ss:$8 sps:$4 sm:$0xff]   ;;  %v5259_v24 = vld [vmem:[#allocation13 + $0xb0] ss:$8 sps:$4 sm:$0xff]  }
 0x834   : > { %3185 = vmatpush1.bf16.msra.mxu0 %v4609_v49  ;;  %3226 = vmatpush1.bf16.msra.mxu1 %v4611_v50  ;;  %v2377_v49 = vld [vmem:[#allocation11 + $0x2d8] sm:$0xff] }
 0x835   : > { %3186 = vmatprep.subr.bf16.mxu0 %v4618_v51  ;;  %3227 = vmatprep.subr.bf16.mxu1 %v4620_v52  ;;  %v2381_v50 = vld [vmem:[#allocation11 + $0x2f8] sm:$0xff]  ;;  %v4665_v51 = vcombine.low %v2368_v37, %v2372_v40  ;;  %v4667_v52 = vcombine.low %v2369_v41, %v2373_v42 }
 0x836   : > { %v4676_v53 = vcombine.high %v2377_v49, %v2381_v50  ;;  %v5201_v37 = vld [vmem:[#allocation13 + $0x14] ss:$8 sps:$4 sm:$0xff]   ;;  %v5199_v41 = vld [vmem:[#allocation13 + $0x10] ss:$8 sps:$4 sm:$0xff]  }
 0x837   : > { %v5204_v40 = vld [vmem:[#allocation13 + $0x114] ss:$8 sps:$4 sm:$0xff]   ;;  %v5202_v42 = vld [vmem:[#allocation13 + $0x110] ss:$8 sps:$4 sm:$0xff]  }
 0x838   : > { %3187 = vmatpush1.bf16.msra.mxu0 %v4617_v55  ;;  %3228 = vmatpush1.bf16.msra.mxu1 %v4619_v56  ;;  %v2385_v55 = vld [vmem:[#allocation11 + $0x318] sm:$0xff] }
 0x839   : > { %3188 = vmatprep.subr.bf16.mxu0 %v4626_v57  ;;  %3229 = vmatprep.subr.bf16.mxu1 %v4628_v58  ;;  %v2389_v56 = vld [vmem:[#allocation11 + $0x338] sm:$0xff]  ;;  %v4673_v57 = vcombine.low %v2376_v47, %v2380_v48  ;;  %v4675_v58 = vcombine.low %v2377_v49, %v2381_v50  ;;  %v5219_v50 = vld [vmem:[#allocation13 + $0x44] ss:$8 sps:$4 sm:$0xff]  }
 0x83a   : > { %v4684_v62 = vcombine.high %v2385_v55, %v2389_v56  ;;  %v5213_v47 = vld [vmem:[#allocation13 + $0x34] ss:$8 sps:$4 sm:$0xff]   ;;  %v5211_v49 = vld [vmem:[#allocation13 + $0x30] ss:$8 sps:$4 sm:$0xff]  }
 0x83b   : > { %v5216_v48 = vld [vmem:[#allocation13 + $0x134] ss:$8 sps:$4 sm:$0xff]  }
 0x83c   : > { %3189 = vmatpush1.bf16.msra.mxu0 %v4625_v2  ;;  %3230 = vmatpush1.bf16.msra.mxu1 %v4627_v6  ;;  %v2393_v2 = vld [vmem:[#allocation11 + $0x358] sm:$0xff] }
 0x83d   : > { %3190 = vmatprep.subr.bf16.mxu0 %v4634_v7  ;;  %3231 = vmatprep.subr.bf16.mxu1 %v4636_v8  ;;  %v2397_v6 = vld [vmem:[#allocation11 + $0x378] sm:$0xff]  ;;  %v4681_v7 = vcombine.low %v2384_v54, %v2388_v4  ;;  %v4683_v8 = vcombine.low %v2385_v55, %v2389_v56  ;;  %v5231_v56 = vld [vmem:[#allocation13 + $0x64] ss:$8 sps:$4 sm:$0xff]  }
 0x83e   : > { %v4692_v9 = vcombine.high %v2393_v2, %v2397_v6  ;;  %v5228_v54 = vld [vmem:[#allocation13 + $0x154] ss:$8 sps:$4 sm:$0xff]   ;;  %v5223_v4 = vld [vmem:[#allocation13 + $0x50] ss:$8 sps:$4 sm:$0xff]  }
 0x83f   : > { %v5226_v55 = vld [vmem:[#allocation13 + $0x150] ss:$8 sps:$4 sm:$0xff]  }
 0x840   : > { %3191 = vmatpush1.bf16.msra.mxu0 %v4633_v12  ;;  %3232 = vmatpush1.bf16.msra.mxu1 %v4635_v14  ;;  %v2401_v12 = vld [vmem:[#allocation11 + $0x398] sm:$0xff] }
 0x841   : > { %3192 = vmatprep.subr.bf16.mxu0 %v4642_v33  ;;  %3233 = vmatprep.subr.bf16.mxu1 %v4644_v18  ;;  %v2405_v14 = vld [vmem:[#allocation11 + $0x3b8] sm:$0xff]  ;;  %v4689_v33 = vcombine.low %v2392_v63, %v2396_v1  ;;  %v4691_v18 = vcombine.low %v2393_v2, %v2397_v6  ;;  %v5243_v6 = vld [vmem:[#allocation13 + $0x84] ss:$8 sps:$4 sm:$0xff]  }
 0x842   : > { %v4700_v21 = vcombine.high %v2401_v12, %v2405_v14  ;;  %v5240_v63 = vld [vmem:[#allocation13 + $0x174] ss:$8 sps:$4 sm:$0xff]   ;;  %v5235_v1 = vld [vmem:[#allocation13 + $0x70] ss:$8 sps:$4 sm:$0xff]  }
 0x843   : > { %v5238_v2 = vld [vmem:[#allocation13 + $0x170] ss:$8 sps:$4 sm:$0xff]  }
 0x844   : > { %3193 = vmatpush1.bf16.msra.mxu0 %v4641_v26  ;;  %3234 = vmatpush1.bf16.msra.mxu1 %v4643_v60  ;;  %v2409_v26 = vld [vmem:[#allocation11 + $0x3d8] sm:$0xff] }
 0x845   : > { %3194 = vmatprep.subr.bf16.mxu0 %v4650_v61  ;;  %3235 = vmatprep.subr.bf16.mxu1 %v4652_v27  ;;  %v2413_v60 = vld [vmem:[#allocation11 + $0x3f8] sm:$0xff]  ;;  %v4697_v61 = vcombine.low %v2400_v10, %v2404_v11  ;;  %v4699_v27 = vcombine.low %v2401_v12, %v2405_v14  ;;  %v5255_v14 = vld [vmem:[#allocation13 + $0xa4] ss:$8 sps:$4 sm:$0xff]  }
 0x846   : > { %v4708_v29 = vcombine.high %v2409_v26, %v2413_v60  ;;  %v4707_v31 = vcombine.low %v2409_v26, %v2413_v60  ;;  %v5252_v10 = vld [vmem:[#allocation13 + $0x194] ss:$8 sps:$4 sm:$0xff]   ;;  %v5247_v11 = vld [vmem:[#allocation13 + $0x90] ss:$8 sps:$4 sm:$0xff]   ;;  %v5267_v60 = vld [vmem:[#allocation13 + $0xc4] ss:$8 sps:$4 sm:$0xff]  }
 0x847   : > { %v5250_v12 = vld [vmem:[#allocation13 + $0x190] ss:$8 sps:$4 sm:$0xff]  }
 0x848   : > { %3195 = vmatpush1.bf16.msra.mxu0 %v4649_v32  ;;  %3236 = vmatpush1.bf16.msra.mxu1 %v4651_v34  ;;  %v5195_v32 = vld [vmem:[#allocation13 + $0x4] ss:$8 sps:$4 sm:$0xff]   ;;  %v5262_v26 = vld [vmem:[#allocation13 + $0x1b0] ss:$8 sps:$4 sm:$0xff]  }
 0x849   : > { %3196 = vmatprep.subr.bf16.mxu0 %v4658_v35  ;;  %3237 = vmatprep.subr.bf16.mxu1 %v4660_v36  ;;  %v5198_v34 = vld [vmem:[#allocation13 + $0x104] ss:$8 sps:$4 sm:$0xff]   ;;  %v5193_v35 = vld [vmem:[#allocation13] ss:$8 sps:$4 sm:$0xff]  }
 0x84a   : > { %v5196_v36 = vld [vmem:[#allocation13 + $0x100] ss:$8 sps:$4 sm:$0xff]  }
 0x84c   : > { %3197 = vmatpush1.bf16.msra.mxu0 %v4657_v43  ;;  %3238 = vmatpush1.bf16.msra.mxu1 %v4659_v44  ;;  %v5207_v43 = vld [vmem:[#allocation13 + $0x24] ss:$8 sps:$4 sm:$0xff]  }
 0x84d   : > { %3198 = vmatprep.subr.bf16.mxu0 %v4666_v45  ;;  %3239 = vmatprep.subr.bf16.mxu1 %v4668_v46  ;;  %v5210_v44 = vld [vmem:[#allocation13 + $0x124] ss:$8 sps:$4 sm:$0xff]   ;;  %v5205_v45 = vld [vmem:[#allocation13 + $0x20] ss:$8 sps:$4 sm:$0xff]  }
 0x84e   : > { %v5208_v46 = vld [vmem:[#allocation13 + $0x120] ss:$8 sps:$4 sm:$0xff]  }
 0x850   : > { %3199 = vmatpush1.bf16.msra.mxu0 %v4665_v51  ;;  %3240 = vmatpush1.bf16.msra.mxu1 %v4667_v52  ;;  %v5222_v51 = vld [vmem:[#allocation13 + $0x144] ss:$8 sps:$4 sm:$0xff]   ;;  %v5217_v52 = vld [vmem:[#allocation13 + $0x40] ss:$8 sps:$4 sm:$0xff]  }
 0x851   : > { %3200 = vmatprep.subr.bf16.mxu0 %v4674_v0  ;;  %3241 = vmatprep.subr.bf16.mxu1 %v4676_v53  ;;  %v5220_v0 = vld [vmem:[#allocation13 + $0x140] ss:$8 sps:$4 sm:$0xff]   ;;  %v5225_v53 = vld [vmem:[#allocation13 + $0x54] ss:$8 sps:$4 sm:$0xff]  }
 0x854   : > { %3201 = vmatpush1.bf16.msra.mxu0 %v4673_v57  ;;  %3242 = vmatpush1.bf16.msra.mxu1 %v4675_v58  ;;  %v5234_v57 = vld [vmem:[#allocation13 + $0x164] ss:$8 sps:$4 sm:$0xff]   ;;  %v5229_v58 = vld [vmem:[#allocation13 + $0x60] ss:$8 sps:$4 sm:$0xff]  }
 0x855   : > { %3202 = vmatprep.subr.bf16.mxu0 %v4682_v59  ;;  %3243 = vmatprep.subr.bf16.mxu1 %v4684_v62  ;;  %v5232_v59 = vld [vmem:[#allocation13 + $0x160] ss:$8 sps:$4 sm:$0xff]   ;;  %v5237_v62 = vld [vmem:[#allocation13 + $0x74] ss:$8 sps:$4 sm:$0xff]  }
 0x858   : > { %3203 = vmatpush1.bf16.msra.mxu0 %v4681_v7  ;;  %3244 = vmatpush1.bf16.msra.mxu1 %v4683_v8  ;;  %v5246_v7 = vld [vmem:[#allocation13 + $0x184] ss:$8 sps:$4 sm:$0xff]   ;;  %v5241_v8 = vld [vmem:[#allocation13 + $0x80] ss:$8 sps:$4 sm:$0xff]  }
 0x859   : > { %3204 = vmatprep.subr.bf16.mxu0 %v4690_v13  ;;  %3245 = vmatprep.subr.bf16.mxu1 %v4692_v9  ;;  %v5244_v13 = vld [vmem:[#allocation13 + $0x180] ss:$8 sps:$4 sm:$0xff]   ;;  %v5249_v9 = vld [vmem:[#allocation13 + $0x94] ss:$8 sps:$4 sm:$0xff]  }
 0x85c   : > { %3205 = vmatpush1.bf16.msra.mxu0 %v4689_v33  ;;  %3246 = vmatpush1.bf16.msra.mxu1 %v4691_v18  ;;  %v5258_v33 = vld [vmem:[#allocation13 + $0x1a4] ss:$8 sps:$4 sm:$0xff]   ;;  %v5253_v18 = vld [vmem:[#allocation13 + $0xa0] ss:$8 sps:$4 sm:$0xff]  }
 0x85d   : > { %3206 = vmatprep.subr.bf16.mxu0 %v4698_v20  ;;  %3247 = vmatprep.subr.bf16.mxu1 %v4700_v21  ;;  %v5256_v20 = vld [vmem:[#allocation13 + $0x1a0] ss:$8 sps:$4 sm:$0xff]   ;;  %v5261_v21 = vld [vmem:[#allocation13 + $0xb4] ss:$8 sps:$4 sm:$0xff]  }
 0x860   : > { %3207 = vmatpush1.bf16.msra.mxu0 %v4697_v61  ;;  %3248 = vmatpush1.bf16.msra.mxu1 %v4699_v27  ;;  %v5270_v61 = vld [vmem:[#allocation13 + $0x1c4] ss:$8 sps:$4 sm:$0xff]   ;;  %v5265_v27 = vld [vmem:[#allocation13 + $0xc0] ss:$8 sps:$4 sm:$0xff]  }
 0x861   : > { %3208 = vmatprep.subr.bf16.mxu0 %v4706_v28  ;;  %3249 = vmatprep.subr.bf16.mxu1 %v4708_v29  ;;  %v5268_v28 = vld [vmem:[#allocation13 + $0x1c0] ss:$8 sps:$4 sm:$0xff]   ;;  %v5273_v29 = vld [vmem:[#allocation13 + $0xd4] ss:$8 sps:$4 sm:$0xff]  }
 0x864   : > { %3209 = vmatpush1.bf16.msra.mxu0 %v4705_v30  ;;  %3250 = vmatpush1.bf16.msra.mxu1 %v4707_v31  ;;  %v5276_v30 = vld [vmem:[#allocation13 + $0x1d4] ss:$8 sps:$4 sm:$0xff]   ;;  %v5271_v31 = vld [vmem:[#allocation13 + $0xd0] ss:$8 sps:$4 sm:$0xff]  }
 0x865   : > { %4112 = vmatprep.subr.bf16.mxu0 %v5195_v32  ;;  %4153 = vmatprep.subr.bf16.mxu1 %v5198_v34  ;;  %v5274_v32 = vld [vmem:[#allocation13 + $0x1d0] ss:$8 sps:$4 sm:$0xff]   ;;  %v5279_v34 = vld [vmem:[#allocation13 + $0xe4] ss:$8 sps:$4 sm:$0xff]  }
 0x867   : > { %3211 = vmatmul.mubr.bf16.vlgmr.msra.gmra.mrb[20].mxu0 %v6251_v25  ;;  %3252 = vmatmul.mubr.bf16.vlgmr.msra.gmra.mrb[20].mxu1 %v6251_v25  ;;  %v5214_v25 = vld [vmem:[#allocation13 + $0x130] ss:$8 sps:$4 sm:$0xff]  }
 0x868   : > { %4113 = vmatpush1.bf16.msra.mxu0 %v5193_v35  ;;  %4154 = vmatpush1.bf16.msra.mxu1 %v5196_v36  ;;  %v5282_v35 = vld [vmem:[#allocation13 + $0x1e4] ss:$8 sps:$4 sm:$0xff]   ;;  %v5277_v36 = vld [vmem:[#allocation13 + $0xe0] ss:$8 sps:$4 sm:$0xff]  }
 0x869   : > { %4114 = vmatprep.subr.bf16.mxu0 %v5201_v37  ;;  %4155 = vmatprep.subr.bf16.mxu1 %v5204_v40  ;;  %v5280_v37 = vld [vmem:[#allocation13 + $0x1e0] ss:$8 sps:$4 sm:$0xff]   ;;  %v5285_v40 = vld [vmem:[#allocation13 + $0xf4] ss:$8 sps:$4 sm:$0xff]  }
 0x86c   : > { %4115 = vmatpush1.bf16.msra.mxu0 %v5199_v41  ;;  %4156 = vmatpush1.bf16.msra.mxu1 %v5202_v42  ;;  %v5288_v41 = vld [vmem:[#allocation13 + $0x1f4] ss:$8 sps:$4 sm:$0xff]   ;;  %v5283_v42 = vld [vmem:[#allocation13 + $0xf0] ss:$8 sps:$4 sm:$0xff]  }
 0x86d   : > { %4116 = vmatprep.subr.bf16.mxu0 %v5207_v43  ;;  %4157 = vmatprep.subr.bf16.mxu1 %v5210_v44  ;;  %v5286_v43 = vld [vmem:[#allocation13 + $0x1f0] ss:$8 sps:$4 sm:$0xff]   ;;  %v5291_v44 = vld [vmem:[#allocation13 + $0x204] ss:$8 sps:$4 sm:$0xff]  }
 0x870   : > { %4117 = vmatpush1.bf16.msra.mxu0 %v5205_v45  ;;  %4158 = vmatpush1.bf16.msra.mxu1 %v5208_v46  ;;  %v5294_v45 = vld [vmem:[#allocation13 + $0x304] ss:$8 sps:$4 sm:$0xff]   ;;  %v6260_v46 = vld [vmem:[%s6400_s12] sm:$0xff]  ;;  %s5635_s12 = scalar_lea.vmem %s5634_s1, 512 }
 0x871   : > { %4118 = vmatprep.subr.bf16.mxu0 %v5213_v47  ;;  %4159 = vmatprep.subr.bf16.mxu1 %v5216_v48  ;;  %v2419_v47 = vrot.slane %v6260_v46, %v6090_v17  ;;  %v2427_v48 = vrot.slane %v6260_v46, %v698_v3  ;;  %p5637_p1 = scmp.lt.s32.totalorder %s5635_s12, %s5629_s8 }
 0x873   : > { %p5638_p3 = por %p5637_p1, %p5636_p4 }
 0x874   : > { %4119 = vmatpush1.bf16.msra.mxu0 %v5211_v49  ;;  %4160 = vmatpush1.bf16.msra.mxu1 %v5214_v25  ;;  %v2423_v49 = vrot.slane %v6260_v46, %v6087_v16  ;;  %v2431_v25 = vrot.slane %v6260_v46, %v702_v5 }
 0x875   : > { %4120 = vmatprep.subr.bf16.mxu0 %v5219_v50  ;;  %4161 = vmatprep.subr.bf16.mxu1 %v5222_v51  ;;  %p5639_p9 = pnand %p5638_p3, %p5632_p7 }
 0x878   : > { %4121 = vmatpush1.bf16.msra.mxu0 %v5217_v52  ;;  %4162 = vmatpush1.bf16.msra.mxu1 %v5220_v0 }
 0x879   : > { %4122 = vmatprep.subr.bf16.mxu0 %v5225_v53  ;;  %4163 = vmatprep.subr.bf16.mxu1 %v5228_v54 }
 0x87c   : > { %4123 = vmatpush1.bf16.msra.mxu0 %v5223_v4  ;;  %4164 = vmatpush1.bf16.msra.mxu1 %v5226_v55 }
 0x87d   : > { %4124 = vmatprep.subr.bf16.mxu0 %v5231_v56  ;;  %4165 = vmatprep.subr.bf16.mxu1 %v5234_v57 }
 0x880   : > { %4125 = vmatpush1.bf16.msra.mxu0 %v5229_v58  ;;  %4166 = vmatpush1.bf16.msra.mxu1 %v5232_v59 }
 0x881   : > { %4126 = vmatprep.subr.bf16.mxu0 %v5237_v62  ;;  %4167 = vmatprep.subr.bf16.mxu1 %v5240_v63 }
 0x884   : > { %4127 = vmatpush1.bf16.msra.mxu0 %v5235_v1  ;;  %4168 = vmatpush1.bf16.msra.mxu1 %v5238_v2 }
 0x885   : > { %4128 = vmatprep.subr.bf16.mxu0 %v5243_v6  ;;  %4169 = vmatprep.subr.bf16.mxu1 %v5246_v7 }
 0x888   : > { %4129 = vmatpush1.bf16.msra.mxu0 %v5241_v8  ;;  %4170 = vmatpush1.bf16.msra.mxu1 %v5244_v13 }
 0x889   : > { %4130 = vmatprep.subr.bf16.mxu0 %v5249_v9  ;;  %4171 = vmatprep.subr.bf16.mxu1 %v5252_v10 }
 0x88c   : > { %4131 = vmatpush1.bf16.msra.mxu0 %v5247_v11  ;;  %4172 = vmatpush1.bf16.msra.mxu1 %v5250_v12 }
 0x88d   : > { %4132 = vmatprep.subr.bf16.mxu0 %v5255_v14  ;;  %4173 = vmatprep.subr.bf16.mxu1 %v5258_v33 }
 0x890   : > { %4133 = vmatpush1.bf16.msra.mxu0 %v5253_v18  ;;  %4174 = vmatpush1.bf16.msra.mxu1 %v5256_v20 }
 0x891   : > { %4134 = vmatprep.subr.bf16.mxu0 %v5261_v21  ;;  %4175 = vmatprep.subr.bf16.mxu1 %v5264_v23 }
 0x894   : > { %4135 = vmatpush1.bf16.msra.mxu0 %v5259_v24  ;;  %4176 = vmatpush1.bf16.msra.mxu1 %v5262_v26 }
 0x895   : > { %4136 = vmatprep.subr.bf16.mxu0 %v5267_v60  ;;  %4177 = vmatprep.subr.bf16.mxu1 %v5270_v61 }
 0x898   : > { %4137 = vmatpush1.bf16.msra.mxu0 %v5265_v27  ;;  %4178 = vmatpush1.bf16.msra.mxu1 %v5268_v28  ;;  %v5289_v28 = vld [vmem:[#allocation13 + $0x200] ss:$8 sps:$4 sm:$0xff]  }
 0x899   : > { %4138 = vmatprep.subr.bf16.mxu0 %v5273_v29  ;;  %4179 = vmatprep.subr.bf16.mxu1 %v5276_v30 }
 0x89c   : > { %4139 = vmatpush1.bf16.msra.mxu0 %v5271_v31  ;;  %4180 = vmatpush1.bf16.msra.mxu1 %v5274_v32  ;;  %v5292_v31 = vld [vmem:[#allocation13 + $0x300] ss:$8 sps:$4 sm:$0xff]   ;;  %v5297_v32 = vld [vmem:[#allocation13 + $0x214] ss:$8 sps:$4 sm:$0xff]  }
 0x89d   : > { %4140 = vmatprep.subr.bf16.mxu0 %v5279_v34  ;;  %4181 = vmatprep.subr.bf16.mxu1 %v5282_v35  ;;  %v5300_v35 = vld [vmem:[#allocation13 + $0x314] ss:$8 sps:$4 sm:$0xff]  }
 0x8a0   : > { %4141 = vmatpush1.bf16.msra.mxu0 %v5277_v36  ;;  %4182 = vmatpush1.bf16.msra.mxu1 %v5280_v37  ;;  %v5295_v36 = vld [vmem:[#allocation13 + $0x210] ss:$8 sps:$4 sm:$0xff]  }
 0x8a1   : > { %4142 = vmatprep.subr.bf16.mxu0 %v5285_v40  ;;  %4183 = vmatprep.subr.bf16.mxu1 %v5288_v41  ;;  %v5298_v37 = vld [vmem:[#allocation13 + $0x310] ss:$8 sps:$4 sm:$0xff]   ;;  %v5303_v40 = vld [vmem:[#allocation13 + $0x224] ss:$8 sps:$4 sm:$0xff]  }
 0x8a2   : > { %v5306_v41 = vld [vmem:[#allocation13 + $0x324] ss:$8 sps:$4 sm:$0xff]  }
 0x8a4   : > { %4143 = vmatpush1.bf16.msra.mxu0 %v5283_v42  ;;  %4184 = vmatpush1.bf16.msra.mxu1 %v5286_v43  ;;  %v5301_v42 = vld [vmem:[#allocation13 + $0x220] ss:$8 sps:$4 sm:$0xff]  }
 0x8a5   : > { %4194 = vmatprep.subr.bf16.mxu0 %v5291_v44  ;;  %4235 = vmatprep.subr.bf16.mxu1 %v5294_v45  ;;  %v5304_v43 = vld [vmem:[#allocation13 + $0x320] ss:$8 sps:$4 sm:$0xff]   ;;  %v5309_v44 = vld [vmem:[#allocation13 + $0x234] ss:$8 sps:$4 sm:$0xff]  }
 0x8a6   : > { %v5312_v45 = vld [vmem:[#allocation13 + $0x334] ss:$8 sps:$4 sm:$0xff]  }
 0x8fa   : > { %v3130_v50 = vpop.f32.mrb[16].mxu0  ;;  %v3171_v51 = vpop.f32.mrb[16].mxu1 }
 0x8fb   : > { %v3131_v52 = vadd.f32 %v3130_v50, %v2419_v47  ;;  %v3172_v0 = vadd.f32 %v3171_v51, %v2427_v48  ;;  %v3132_v53 = vpop.f32.mrb[17].mxu0  ;;  %v3173_v54 = vpop.f32.mrb[17].mxu1  ;;  %v5307_v47 = vld [vmem:[#allocation13 + $0x230] ss:$8 sps:$4 sm:$0xff]   ;;  %v5313_v50 = vld [vmem:[#allocation13 + $0x240] ss:$8 sps:$4 sm:$0xff]  }
 0x8fc   : > { %v3133_v4 = vadd.f32 %v3132_v53, %v2423_v49  ;;  %v3174_v55 = vadd.f32 %v3173_v54, %v2431_v25  ;;  %v3134_v56 = vpop.f32.mrb[18].mxu0  ;;  %v3175_v57 = vpop.f32.mrb[18].mxu1  ;;  %v5310_v48 = vld [vmem:[#allocation13 + $0x330] ss:$8 sps:$4 sm:$0xff]   ;;  %v5315_v49 = vld [vmem:[#allocation13 + $0x244] ss:$8 sps:$4 sm:$0xff]  }
 0x8fd   : > { %v4709_v58 = vmul.f32 -1.702, %v3131_v52  ;;  %v4711_v59 = vmul.f32 -1.702, %v3172_v0  ;;  %v3135_v3 = vpop.f32.mrb[19].mxu0  ;;  %v3176_v62 = vpop.f32.mrb[19].mxu1 }
 0x8fe   : > { %v4710_v63 = vmul.f32 -1.702, %v3133_v4  ;;  %v4712_v1 = vmul.f32 -1.702, %v3174_v55  ;;  %v5318_v25 = vld [vmem:[#allocation13 + $0x344] ss:$8 sps:$4 sm:$0xff]   ;;  %v2435_v62 = vrot.slane %v6260_v46, %v706_v38 }
 0x8ff   : > { %v3276_v2 = vmul.f32 1.442695, %v4709_v58  ;;  %v3280_v6 = vmul.f32 1.442695, %v4711_v59  ;;  %v5316_v51 = vld [vmem:[#allocation13 + $0x340] ss:$8 sps:$4 sm:$0xff]  }
 0x900   : > { %v3278_v7 = vmul.f32 1.442695, %v4710_v63  ;;  %v3282_v5 = vmul.f32 1.442695, %v4712_v1  ;;  %v5319_v53 = vld [vmem:[#allocation13 + $0x250] ss:$8 sps:$4 sm:$0xff]  }
 0x901   : > { %5397 = vpow2.f32 %v3276_v2  ;;  %v5322_v54 = vld [vmem:[#allocation13 + $0x350] ss:$8 sps:$4 sm:$0xff]   ;;  %v2442_v56 = vsub.s32 6, %v6084_v15  ;;  %v2446_v57 = vsub.s32 7, %v6084_v15  ;;  %v5325_v58 = vld [vmem:[#allocation13 + $0x260] ss:$8 sps:$4 sm:$0xff]   ;;  %v2439_v2 = vrot.slane %v6260_v46, %v710_v39 }
 0x902   : > { %5399 = vpow2.f32 %v3280_v6  ;;  %v5328_v59 = vld [vmem:[#allocation13 + $0x360] ss:$8 sps:$4 sm:$0xff]   ;;  %v5333_v3 = vld [vmem:[#allocation13 + $0x274] ss:$8 sps:$4 sm:$0xff]   ;;  %v5342_v15 = vld [vmem:[#allocation13 + $0x384] ss:$8 sps:$4 sm:$0xff]  }
 0x903   : > { %5401 = vpow2.f32 %v3278_v7  ;;  %v2443_v63 = vrot.slane %v6260_v46, %v2442_v56  ;;  %v5336_v1 = vld [vmem:[#allocation13 + $0x374] ss:$8 sps:$4 sm:$0xff]   ;;  %v2447_v6 = vrot.slane %v6260_v46, %v2446_v57  ;;  %v5331_v7 = vld [vmem:[#allocation13 + $0x270] ss:$8 sps:$4 sm:$0xff]  }
 0x904   : > { %5403 = vpow2.f32 %v3282_v5  ;;  %v5372_v57 = vld [vmem:[#allocation13 + $0x3d4] ss:$8 sps:$4 sm:$0xff]  }
 0x90b   : > { %v5398_v8 = vpop.eup %5397 }
 0x90c   : > { %v5400_v13 = vpop.eup %5399  ;;  %v3292_v9 = vadd.f32 1.0, %v5398_v8 }
 0x90d   : > { %v5402_v10 = vpop.eup %5401  ;;  %v3294_v11 = vadd.f32 1.0, %v5400_v13  ;;  %v5334_v13 = vld [vmem:[#allocation13 + $0x370] ss:$8 sps:$4 sm:$0xff]  }
 0x90e   : > { %v5404_v12 = vpop.eup %5403  ;;  %5405 = vrcp.f32 %v3292_v9  ;;  %v3293_v14 = vadd.f32 1.0, %v5402_v10  ;;  %v5339_v9 = vld [vmem:[#allocation13 + $0x284] ss:$8 sps:$4 sm:$0xff]  }
 0x90f   : > { %5407 = vrcp.f32 %v3294_v11  ;;  %v3295_v33 = vadd.f32 1.0, %v5404_v12 }
 0x910   : > { %5409 = vrcp.f32 %v3293_v14 }
 0x911   : > { %5411 = vrcp.f32 %v3295_v33 }
 0x918   : > { %v5406_v18 = vpop.eup %5405 }
 0x919   : > { %v5408_v20 = vpop.eup %5407  ;;  %v3316_v23 = vmul.f32 %v5406_v18, %v3131_v52  ;;  %v5321_v52 = vld [vmem:[#allocation13 + $0x254] ss:$8 sps:$4 sm:$0xff]   ;;  %v5337_v18 = vld [vmem:[#allocation13 + $0x280] ss:$8 sps:$4 sm:$0xff]  }
 0x91a   : > { %v5410_v21 = vpop.eup %5409  ;;  %v3318_v26 = vmul.f32 %v5408_v20, %v3172_v0  ;;  %v5324_v0 = vld [vmem:[#allocation13 + $0x354] ss:$8 sps:$4 sm:$0xff]   ;;  %v5340_v20 = vld [vmem:[#allocation13 + $0x380] ss:$8 sps:$4 sm:$0xff]  }
 0x91b   : > { %v5412_v24 = vpop.eup %5411  ;;  %v3317_v60 = vmul.f32 %v5410_v21, %v3133_v4  ;;  %v3324_v29 = vpack.c.bf16 %v3316_v23, %v3316_v23  ;;  %v5327_v4 = vld [vmem:[#allocation13 + $0x264] ss:$8 sps:$4 sm:$0xff]  }
 0x91c   : > { %v3319_v61 = vmul.f32 %v5412_v24, %v3174_v55  ;;  %v3326_v34 = vpack.c.bf16 %v3318_v26, %v3318_v26  ;;  %v5330_v55 = vld [vmem:[#allocation13 + $0x364] ss:$8 sps:$4 sm:$0xff]  }
 0x91d   : > { %v3325_v27 = vpack.c.bf16 %v3317_v60, %v3317_v60 }
 0x91e   : > { %v3327_v30 = vpack.c.bf16 %v3319_v61, %v3319_v61 }
 0x91f   : > { %4144 = vmatprep.mubr.bf16.mxu0 %v3325_v27  ;;  %v5345_v27 = vld [vmem:[#allocation13 + $0x294] ss:$8 sps:$4 sm:$0xff]  }
 0x920   : > { %4185 = vmatprep.mubr.bf16.mxu1 %v3327_v30  ;;  %4145 = vmatmul.mubr.bf16.vlgmr.msra.gmra.mrb[24].mxu0 %v3324_v29  ;;  %v5348_v30 = vld [vmem:[#allocation13 + $0x394] ss:$8 sps:$4 sm:$0xff]  }
 0x921   : > { %4186 = vmatmul.mubr.bf16.vlgmr.msra.gmra.mrb[24].mxu1 %v3326_v34  ;;  %4195 = vmatpush1.bf16.msra.mxu0 %v5289_v28  ;;  %v5343_v34 = vld [vmem:[#allocation13 + $0x290] ss:$8 sps:$4 sm:$0xff]  }
 0x922   : > { %4236 = vmatpush1.bf16.msra.mxu1 %v5292_v31  ;;  %4196 = vmatprep.subr.bf16.mxu0 %v5297_v32 }
 0x923   : > { %4237 = vmatprep.subr.bf16.mxu1 %v5300_v35  ;;  %v5346_v35 = vld [vmem:[#allocation13 + $0x390] ss:$8 sps:$4 sm:$0xff]  }
 0x925   : > { %4197 = vmatpush1.bf16.msra.mxu0 %v5295_v36  ;;  %v5351_v36 = vld [vmem:[#allocation13 + $0x2a4] ss:$8 sps:$4 sm:$0xff]  }
 0x926   : > { %4238 = vmatpush1.bf16.msra.mxu1 %v5298_v37  ;;  %4198 = vmatprep.subr.bf16.mxu0 %v5303_v40  ;;  %v5354_v37 = vld [vmem:[#allocation13 + $0x3a4] ss:$8 sps:$4 sm:$0xff]   ;;  %v5349_v40 = vld [vmem:[#allocation13 + $0x2a0] ss:$8 sps:$4 sm:$0xff]  }
 0x927   : > { %4239 = vmatprep.subr.bf16.mxu1 %v5306_v41  ;;  %v5352_v41 = vld [vmem:[#allocation13 + $0x3a0] ss:$8 sps:$4 sm:$0xff]  }
 0x929   : > { %4199 = vmatpush1.bf16.msra.mxu0 %v5301_v42  ;;  %v5357_v42 = vld [vmem:[#allocation13 + $0x2b4] ss:$8 sps:$4 sm:$0xff]  }
 0x92a   : > { %4240 = vmatpush1.bf16.msra.mxu1 %v5304_v43  ;;  %4200 = vmatprep.subr.bf16.mxu0 %v5309_v44  ;;  %v5360_v43 = vld [vmem:[#allocation13 + $0x3b4] ss:$8 sps:$4 sm:$0xff]   ;;  %v5355_v44 = vld [vmem:[#allocation13 + $0x2b0] ss:$8 sps:$4 sm:$0xff]  }
 0x92b   : > { %4241 = vmatprep.subr.bf16.mxu1 %v5312_v45  ;;  %v5358_v45 = vld [vmem:[#allocation13 + $0x3b0] ss:$8 sps:$4 sm:$0xff]  }
 0x92d   : > { %4201 = vmatpush1.bf16.msra.mxu0 %v5307_v47  ;;  %v5363_v47 = vld [vmem:[#allocation13 + $0x2c4] ss:$8 sps:$4 sm:$0xff]  }
 0x92e   : > { %4242 = vmatpush1.bf16.msra.mxu1 %v5310_v48  ;;  %4202 = vmatprep.subr.bf16.mxu0 %v5315_v49  ;;  %v5366_v49 = vld [vmem:[#allocation13 + $0x3c4] ss:$8 sps:$4 sm:$0xff]  }
 0x92f   : > { %4243 = vmatprep.subr.bf16.mxu1 %v5318_v25 }
 0x931   : > { %4203 = vmatpush1.bf16.msra.mxu0 %v5313_v50 }
 0x932   : > { %4244 = vmatpush1.bf16.msra.mxu1 %v5316_v51  ;;  %4204 = vmatprep.subr.bf16.mxu0 %v5321_v52 }
 0x933   : > { %4245 = vmatprep.subr.bf16.mxu1 %v5324_v0  ;;  %v5361_v0 = vld [vmem:[#allocation13 + $0x2c0] ss:$8 sps:$4 sm:$0xff]  }
 0x935   : > { %4205 = vmatpush1.bf16.msra.mxu0 %v5319_v53 }
 0x936   : > { %4246 = vmatpush1.bf16.msra.mxu1 %v5322_v54  ;;  %4206 = vmatprep.subr.bf16.mxu0 %v5327_v4  ;;  %v5364_v4 = vld [vmem:[#allocation13 + $0x3c0] ss:$8 sps:$4 sm:$0xff]  }
 0x937   : > { %4247 = vmatprep.subr.bf16.mxu1 %v5330_v55  ;;  %v5369_v55 = vld [vmem:[#allocation13 + $0x2d4] ss:$8 sps:$4 sm:$0xff]  }
 0x939   : > { %4207 = vmatpush1.bf16.msra.mxu0 %v5325_v58  ;;  %v5367_v58 = vld [vmem:[#allocation13 + $0x2d0] ss:$8 sps:$4 sm:$0xff]  }
 0x93a   : > { %4248 = vmatpush1.bf16.msra.mxu1 %v5328_v59  ;;  %v3212_v5 = vpop.f32.mrb[20].mxu0  ;;  %v3253_v8 = vpop.f32.mrb[20].mxu1  ;;  %4208 = vmatprep.subr.bf16.mxu0 %v5333_v3  ;;  %v5370_v59 = vld [vmem:[#allocation13 + $0x3d0] ss:$8 sps:$4 sm:$0xff]   ;;  %v5375_v3 = vld [vmem:[#allocation13 + $0x2e4] ss:$8 sps:$4 sm:$0xff]  }
 0x93b   : > { %v6282_v10 = vadd.f32 %v3212_v5, %v2435_v62  ;;  %v6284_v38 = vadd.f32 %v3253_v8, %v2443_v63  ;;  %v3214_v11 = vpop.f32.mrb[21].mxu0  ;;  %v3255_v12 = vpop.f32.mrb[21].mxu1  ;;  %4249 = vmatprep.subr.bf16.mxu1 %v5336_v1  ;;  %v5378_v62 = vld [vmem:[#allocation13 + $0x3e4] ss:$8 sps:$4 sm:$0xff]   ;;  %v5373_v63 = vld [vmem:[#allocation13 + $0x2e0] ss:$8 sps:$4 sm:$0xff]  }
 0x93c   : > { %v6286_v14 = vadd.f32 %v3214_v11, %v2439_v2  ;;  %v6288_v39 = vadd.f32 %v3255_v12, %v2447_v6  ;;  %v3216_v46 = vpop.f32.mrb[22].mxu0  ;;  %v3257_v33 = vpop.f32.mrb[22].mxu1  ;;  %v5376_v1 = vld [vmem:[#allocation13 + $0x3e0] ss:$8 sps:$4 sm:$0xff]   ;;  %v5381_v2 = vld [vmem:[#allocation13 + $0x2f4] ss:$8 sps:$4 sm:$0xff]  }
 0x93d   : > { %v4713_v21 = vmul.f32 -1.702, %v6282_v10  ;;  %v4715_v23 = vmul.f32 -1.702, %v6284_v38  ;;  %4209 = vmatpush1.bf16.msra.mxu0 %v5331_v7  ;;  %v3217_v24 = vpop.f32.mrb[23].mxu0  ;;  %v3258_v26 = vpop.f32.mrb[23].mxu1 }
 0x93e   : > { %v4714_v60 = vmul.f32 -1.702, %v6286_v14  ;;  %v4716_v61 = vmul.f32 -1.702, %v6288_v39  ;;  %4250 = vmatpush1.bf16.msra.mxu1 %v5334_v13  ;;  %4210 = vmatprep.subr.bf16.mxu0 %v5339_v9  ;;  %v5384_v6 = vld [vmem:[#allocation13 + $0x3f4] ss:$8 sps:$4 sm:$0xff]  }
 0x93f   : > { %v3284_v28 = vmul.f32 1.442695, %v4713_v21  ;;  %v3288_v29 = vmul.f32 1.442695, %v4715_v23  ;;  %4251 = vmatprep.subr.bf16.mxu1 %v5342_v15  ;;  %v5379_v8 = vld [vmem:[#allocation13 + $0x2f0] ss:$8 sps:$4 sm:$0xff]  }
 0x940   : > { %v3286_v31 = vmul.f32 1.442695, %v4714_v60  ;;  %v3290_v32 = vmul.f32 1.442695, %v4716_v61  ;;  %v5382_v11 = vld [vmem:[#allocation13 + $0x3f0] ss:$8 sps:$4 sm:$0xff]  }
 0x941   : > { %5413 = vpow2.f32 %v3284_v28  ;;  %4211 = vmatpush1.bf16.msra.mxu0 %v5337_v18 }
 0x942   : > { %5415 = vpow2.f32 %v3288_v29  ;;  %4252 = vmatpush1.bf16.msra.mxu1 %v5340_v20  ;;  %4212 = vmatprep.subr.bf16.mxu0 %v5345_v27 }
 0x943   : > { %5417 = vpow2.f32 %v3286_v31  ;;  %4253 = vmatprep.subr.bf16.mxu1 %v5348_v30 }
 0x944   : > { %5419 = vpow2.f32 %v3290_v32 }
 0x945   : > { %4213 = vmatpush1.bf16.msra.mxu0 %v5343_v34 }
 0x946   : > { %4254 = vmatpush1.bf16.msra.mxu1 %v5346_v35  ;;  %4214 = vmatprep.subr.bf16.mxu0 %v5351_v36 }
 0x947   : > { %4255 = vmatprep.subr.bf16.mxu1 %v5354_v37 }
 0x949   : > { %4215 = vmatpush1.bf16.msra.mxu0 %v5349_v40 }
 0x94a   : > { %4256 = vmatpush1.bf16.msra.mxu1 %v5352_v41  ;;  %4216 = vmatprep.subr.bf16.mxu0 %v5357_v42 }
 0x94b   : > { %v5414_v48 = vpop.eup %5413  ;;  %4257 = vmatprep.subr.bf16.mxu1 %v5360_v43 }
 0x94c   : > { %v5416_v25 = vpop.eup %5415  ;;  %v3296_v50 = vadd.f32 1.0, %v5414_v48 }
 0x94d   : > { %v5418_v51 = vpop.eup %5417  ;;  %v3298_v52 = vadd.f32 1.0, %v5416_v25  ;;  %4217 = vmatpush1.bf16.msra.mxu0 %v5355_v44 }
 0x94e   : > { %v5420_v53 = vpop.eup %5419  ;;  %5421 = vrcp.f32 %v3296_v50  ;;  %v3297_v54 = vadd.f32 1.0, %v5418_v51  ;;  %4258 = vmatpush1.bf16.msra.mxu1 %v5358_v45  ;;  %4218 = vmatprep.subr.bf16.mxu0 %v5363_v47 }
 0x94f   : > { %5423 = vrcp.f32 %v3298_v52  ;;  %v3299_v56 = vadd.f32 1.0, %v5420_v53  ;;  %4259 = vmatprep.subr.bf16.mxu1 %v5366_v49 }
 0x950   : > { %5425 = vrcp.f32 %v3297_v54 }
 0x951   : > { %5427 = vrcp.f32 %v3299_v56  ;;  %4219 = vmatpush1.bf16.msra.mxu0 %v5361_v0 }
 0x952   : > { %4260 = vmatpush1.bf16.msra.mxu1 %v5364_v4  ;;  %4220 = vmatprep.subr.bf16.mxu0 %v5369_v55 }
 0x953   : > { %4261 = vmatprep.subr.bf16.mxu1 %v5372_v57 }
 0x955   : > { %4221 = vmatpush1.bf16.msra.mxu0 %v5367_v58 }
 0x956   : > { %4262 = vmatpush1.bf16.msra.mxu1 %v5370_v59  ;;  %4222 = vmatprep.subr.bf16.mxu0 %v5375_v3 }
 0x957   : > { %4263 = vmatprep.subr.bf16.mxu1 %v5378_v62 }
 0x958   : > { %v5422_v7 = vpop.eup %5421 }
 0x959   : > { %v5424_v5 = vpop.eup %5423  ;;  %4223 = vmatpush1.bf16.msra.mxu0 %v5373_v63  ;;  %v3320_v9 = vmul.f32 %v5422_v7, %v6282_v10  ;;  %v3460_v10 = vld [vmem:[%s6401_s24] sm:$0x3] }
 0x95a   : > { %v5426_v13 = vpop.eup %5425  ;;  %4264 = vmatpush1.bf16.msra.mxu1 %v5376_v1  ;;  %4224 = vmatprep.subr.bf16.mxu0 %v5381_v2  ;;  %v3322_v15 = vmul.f32 %v5424_v5, %v6284_v38  ;;  %v3465_v38 = vrot.slane %v3460_v10, %v6090_v17 }
 0x95b   : > { %v5428_v12 = vpop.eup %5427  ;;  %v3321_v46 = vmul.f32 %v5426_v13, %v6286_v14  ;;  %4265 = vmatprep.subr.bf16.mxu1 %v5384_v6  ;;  %v3328_v20 = vpack.c.bf16 %v3320_v9, %v3320_v9  ;;  %v3469_v14 = vrot.slane %v3460_v10, %v6087_v16 }
 0x95c   : > { %v3323_v33 = vmul.f32 %v5428_v12, %v6288_v39  ;;  %v3330_v23 = vpack.c.bf16 %v3322_v15, %v3322_v15 }
 0x95d   : > { %v3329_v18 = vpack.c.bf16 %v3321_v46, %v3321_v46  ;;  %4225 = vmatpush1.bf16.msra.mxu0 %v5379_v8 }
 0x95e   : > { %v3331_v21 = vpack.c.bf16 %v3323_v33, %v3323_v33  ;;  %4266 = vmatpush1.bf16.msra.mxu1 %v5382_v11 }
 0x95f   : > { %4226 = vmatprep.mubr.bf16.mxu0 %v3329_v18 }
 0x960   : > { %4267 = vmatprep.mubr.bf16.mxu1 %v3331_v21  ;;  %4227 = vmatmul.mubr.bf16.vlgmr.msra.gmra.mrb[28].mxu0 %v3328_v20 }
 0x961   : > { %4268 = vmatmul.mubr.bf16.vlgmr.msra.gmra.mrb[28].mxu1 %v3330_v23 }
 0x9f3   : > { %v4146_v24 = vpop.f32.mrb[24].mxu0 }
 0x9f4   : > { %v4147_v39 = vadd.f32 %v4146_v24, %v3465_v38  ;;  %v4187_v26 = vpop.f32.mrb[24].mxu1  ;;  %v4148_v60 = vpop.f32.mrb[25].mxu0 }
 0x9f5   : > { %v4149_v61 = vadd.f32 %v4148_v60, %v3469_v14  ;;  %v4189_v27 = vpop.f32.mrb[25].mxu1  ;;  %v4150_v28 = vpop.f32.mrb[26].mxu0 }
 0x9f6   : > { %v4188_v29 = vadd.f32 %v4187_v26, %v4147_v39  ;;  %v4191_v30 = vpop.f32.mrb[26].mxu1  ;;  %v4151_v31 = vpop.f32.mrb[27].mxu0 }
 0x9f7   : > { %v4190_v32 = vadd.f32 %v4189_v27, %v4149_v61  ;;  %v4192_v34 = vpop.f32.mrb[27].mxu1 }
 0xa33   : > { %v4228_v35 = vpop.f32.mrb[28].mxu0 }
 0xa34   : > { %v4229_v36 = vadd.f32 %v4228_v35, %v4188_v29  ;;  %v4269_v37 = vpop.f32.mrb[28].mxu1  ;;  %v4230_v17 = vpop.f32.mrb[29].mxu0 }
 0xa35   : > { %v4231_v40 = vadd.f32 %v4230_v17, %v4190_v32  ;;  %v4271_v16 = vpop.f32.mrb[29].mxu1  ;;  %v4232_v41 = vpop.f32.mrb[30].mxu0 }
 0xa36   : > { %v4270_v42 = vadd.f32 %v4269_v37, %v4229_v36  ;;  %v4273_v43 = vpop.f32.mrb[30].mxu1  ;;  %v4233_v44 = vpop.f32.mrb[31].mxu0 }
 0xa37   : > { %v4272_v45 = vadd.f32 %v4271_v16, %v4231_v40  ;;  %v4274_v47 = vpop.f32.mrb[31].mxu1 }
 0xa38   : > { %v4276_v48 = vadd.f32 %v4270_v42, %v6222_v19 }
 0xa39   : > { %v4277_v49 = vadd.f32 %v4272_v45, %v6225_v22 }
 0xa3a   : > { %4278 = vst [vmem:[%s539_s19] sm:$0xff] %v4276_v48 }
 0xa3b   : > { %4279 = vst [vmem:[%s539_s19 + $0x8] sm:$0xff] %v4277_v49 }
 0xa3c   : > { %5642 = shalt.err (!%p5639_p9)
}
 0xa3d   : > { %s5643_s30 = scalar_lea.hbm %s6311_s29, 256  ;;  %s5647_s24 = scalar_lea.hbm %s6402_s22, 512 }
 0xa3e   : > { %p5644_p13 = scmp.ne.s32.totalorder %s6311_s29, %s5643_s30  ;;  %p5648_p8 = scmp.lt.u32.totalorder %s6311_s29, %s6402_s22 }
 0xa3f   : > { %p5649_p10 = scmp.lt.u32.totalorder %s5647_s24, %s5643_s30  ;;  %p5651_p6 = scmp.lt.u32.totalorder %s5643_s30, %s6311_s29 }
 0xa40   : > { %p5645_p0 = pnand %p5644_p13, %p6403_p12 }
 0xa41   : > { %p5650_p11 = por %p5649_p10, %p5648_p8 }
 0xa42   : > { %p5646_p2 = pneg %p5645_p0 }
 0xa43   : > { %p5652_p5 = por %p5651_p6, %p5650_p11 }
 0xa45   : > { %p5653_p7 = pnand %p5652_p5, %p5646_p2 }
 0xa47   : > { %5656 = shalt.err (!%p5653_p7)
}
 0xa48   : > { %4910 = dma.vmem_to_hbm [thread:$0]  (%p6403_p12), %s6313_s16, 256, %s6311_s29, %s4281_s14  }
 0xa49 PF: > { %s4307_s10 = sand.u32 1, %s5695_s25   ;;  %p6404_p4 = scmp.ne.s32.totalorder %s6389_s7, 0 }
 0xa4a   : > { %p6405_p1 = scmp.ge.s32.totalorder %s5707_s28, 2  ;;  %s4308_s21 = scalar_lea.sflag [#allocation4], %s4307_s10 }
 0xa4c   : > { %p4936_p3 = pnand %p6405_p1, %p6404_p4 }
 0xa4e   : > { %5690 = dma.done.wait (!%p4936_p3), %s4308_s21, 256  }
 0xa4f   : > { %5692 = vsyncadd (!%p4936_p3), %s4308_s21, 4294967040  ;;  %p29_p9 = scmp.ge.s32.totalorder %s5966_s18, 4   ;;  %s6406_s25 = smov %s5699_s26 }
 0xa50   : > { %s6407_s26 = smov %s5703_s27  ;;  %s6408_s27 = smov %s5977_s20 }
 0xa51   : > { %s6409_s28 = smov %s5966_s18  ;;  %31 = sbr.rel (!%p29_p9) target bundleno = 16 (0x10), region = 141 }
 0xa58   :  { %4313 = vsyncpa [#allocation3], 1 }
 0xa59   :  { %4315 = vsyncpa [#allocation3 + $0x1], 1 }
 0xa5a   :  { %4316 = vsyncpa [#allocation6], 1 }
 0xa5b   :  { %4317 = vsyncpa [#allocation9], 1 }
 0xa5c   :  { %4318 = vsyncpa [#allocation12], 1 }
 0xa5d   :  { %4319 = vsyncpa [#allocation4], 1 }
 0xa5e   :  { %4321 = vsyncpa [#allocation4 + $0x1], 1 }

</bundles_post_ra>
